<compile_context>
chip_gen: v7x
topology: tpu7x:2x2x1
jax: 0.10.0
libtpu: 0.0.40
codegen_flags: <defaults>
</compile_context>

<pallas_src>
import functools
import math

import jax
import jax.numpy as jnp
from jax.experimental import pallas as pl
from jax.experimental.pallas import tpu as pltpu

ACT_DTYPE = jnp.bfloat16                       # activations / MXU operands
_FUSED_CONV_VMEM_BUDGET = 20 * 1024 * 1024     # stay inside 32 MiB scoped VMEM
_MM_VMEM_BUDGET = 12 * 1024 * 1024             # matmul double-buffer budget


# ----------------------------------------------------------------------------
# Pallas kernel 1: tiled matmul, bf16 operands, f32 accumulator,
#                  fused BN shift (+ optional residual / ReLU) epilogue
# ----------------------------------------------------------------------------

def _mm_kernel(a_ref, b_ref, shift_ref, o_ref, acc_ref, *, relu):
    @pl.when(pl.program_id(2) == 0)
    def _():
        acc_ref[...] = jnp.zeros_like(acc_ref)

    acc_ref[...] += jnp.dot(a_ref[...], b_ref[...],
                            preferred_element_type=jnp.float32)

    @pl.when(pl.program_id(2) == pl.num_programs(2) - 1)
    def _():
        y = acc_ref[...] + shift_ref[...]
        if relu:
            y = jnp.maximum(y, 0.0)
        o_ref[...] = y.astype(o_ref.dtype)


def _mm_res_kernel(a_ref, b_ref, shift_ref, res_ref, o_ref, acc_ref):
    @pl.when(pl.program_id(2) == 0)
    def _():
        acc_ref[...] = jnp.zeros_like(acc_ref)

    acc_ref[...] += jnp.dot(a_ref[...], b_ref[...],
                            preferred_element_type=jnp.float32)

    @pl.when(pl.program_id(2) == pl.num_programs(2) - 1)
    def _():
        y = acc_ref[...] + shift_ref[...] + res_ref[...].astype(jnp.float32)
        o_ref[...] = jnp.maximum(y, 0.0).astype(o_ref.dtype)


def _tile_candidates(extent, options, quantum):
    """Descending tile candidates that divide `extent`; full extent if it is not
    a multiple of the hardware quantum (full blocks are always legal)."""
    if extent % quantum != 0:
        return (extent,)
    cands = tuple(c for c in options if c <= extent and extent % c == 0)
    return cands if cands else (extent,)


def _pick_tiles(m, k, n, with_res):
    """Biggest (tm, tk, tn) that divide the problem and fit the VMEM budget
    (double-buffered inputs/outputs + f32 accumulator)."""
    tm_c = _tile_candidates(m, (512, 256, 128, 64, 32, 16, 8), 8)
    tk_c = _tile_candidates(k, (1024, 512, 384, 256, 128), 128)
    tn_c = _tile_candidates(n, (512, 256, 128), 128)

    def vmem_bytes(tm, tk, tn):
        b = 2 * (tm * tk * 2 + tk * tn * 2 + tm * tn * 2)   # a, b, out (dbl-buf)
        b += tm * tn * 4 + tn * 4                            # acc + shift
        if with_res:
            b += 2 * tm * tn * 2
        return b

    im = ik = inn = 0
    while vmem_bytes(tm_c[im], tk_c[ik], tn_c[inn]) > _MM_VMEM_BUDGET:
        if ik + 1 < len(tk_c):
            ik += 1
        elif inn + 1 < len(tn_c):
            inn += 1
        elif im + 1 < len(tm_c):
            im += 1
        else:
            break
    return tm_c[im], tk_c[ik], tn_c[inn]


def fused_matmul(a, b, shift, residual=None, relu=True, out_dtype=ACT_DTYPE):
    """out = [relu]( a @ b + shift [+ residual] ).

    a:(M,K), b:(K,N) are cast to bf16 (MXU-native); accumulation & epilogue in f32.
    shift:(N,) holds the folded BN shift. Tiles always divide the problem exactly,
    so no padded copies or output slices are materialized.
    """
    M, K = a.shape
    K2, N = b.shape
    assert K == K2
    a = a.astype(ACT_DTYPE)
    b = b.astype(ACT_DTYPE)
    shift2 = shift.reshape(1, N).astype(jnp.float32)

    tm, tk, tn = _pick_tiles(M, K, N, with_res=residual is not None)
    grid = (M // tm, N // tn, K // tk)

    a_spec = pl.BlockSpec((tm, tk), lambda i, j, k: (i, k))
    b_spec = pl.BlockSpec((tk, tn), lambda i, j, k: (k, j))
    s_spec = pl.BlockSpec((1, tn), lambda i, j, k: (0, j))
    o_spec = pl.BlockSpec((tm, tn), lambda i, j, k: (i, j))
    scratch = [pltpu.VMEM((tm, tn), jnp.float32)]
    cparams = pltpu.CompilerParams(
        dimension_semantics=("parallel", "parallel", "arbitrary"))

    if residual is None:
        out = pl.pallas_call(
            functools.partial(_mm_kernel, relu=relu),
            out_shape=jax.ShapeDtypeStruct((M, N), out_dtype),
            grid_spec=pltpu.PrefetchScalarGridSpec(
                num_scalar_prefetch=0, grid=grid,
                in_specs=[a_spec, b_spec, s_spec],
                out_specs=o_spec, scratch_shapes=scratch),
            compiler_params=cparams,
        )(a, b, shift2)
    else:
        r = residual.astype(ACT_DTYPE)
        r_spec = pl.BlockSpec((tm, tn), lambda i, j, k: (i, j))
        out = pl.pallas_call(
            _mm_res_kernel,
            out_shape=jax.ShapeDtypeStruct((M, N), out_dtype),
            grid_spec=pltpu.PrefetchScalarGridSpec(
                num_scalar_prefetch=0, grid=grid,
                in_specs=[a_spec, b_spec, s_spec, r_spec],
                out_specs=o_spec, scratch_shapes=scratch),
            compiler_params=cparams,
        )(a, b, shift2, r)
    return out


# ----------------------------------------------------------------------------
# Pallas kernel 2: fused 3x3 / stride-1 / pad-1 conv + BN shift + ReLU.
# The padded image is read once per grid step; the 9 taps are contiguous
# shifted slices of the row-flattened image in VMEM (no HBM im2col matrix).
# ----------------------------------------------------------------------------

def _conv3x3_kernel(x_ref, w_ref, shift_ref, o_ref, *, wp, m, relu):
    # x_ref: (1, Hp*Wp, Cin) bf16   flattened zero-padded image
    # w_ref: (9, Cin, Cout)  bf16   BN scale already folded in
    # o_ref: (1, m, Cout)           m = OH*Wp; the 2 junk columns per output row
    #                               (Wp-wide layout) are sliced off by the caller
    cout = o_ref.shape[-1]
    acc = jnp.zeros((m, cout), jnp.float32)
    for t in range(9):
        dh, dw = t // 3, t % 3
        a = x_ref[0, pl.ds(dh * wp + dw, m), :]
        acc = acc + jnp.dot(a, w_ref[t], preferred_element_type=jnp.float32)
    y = acc + shift_ref[...]
    if relu:
        y = jnp.maximum(y, 0.0)
    o_ref[0] = y.astype(o_ref.dtype)


def _conv3x3_fused_vmem_bytes(hp, wp, cin, oh, cout):
    x_bytes = hp * wp * cin * 2
    w_bytes = 9 * cin * cout * 2
    o_bytes = oh * wp * cout * 2
    live = oh * wp * cout * 4 + oh * wp * cin * 2
    return 2 * (x_bytes + w_bytes + o_bytes) + live


def conv3x3_s1_fused(x, w_folded, shift, relu=True):
    """x: (N,H,W,Cin) NHWC, w_folded: (3,3,Cin,Cout) with BN scale folded."""
    n, h, wdt, cin = x.shape
    cout = w_folded.shape[-1]
    oh, ow = h, wdt
    # pad: 1 top, 1 left/right, 2 bottom (the extra zero row keeps the flattened
    # shifted windows of the last tap in-bounds; it only feeds discarded columns)
    xp = jnp.pad(x.astype(ACT_DTYPE), ((0, 0), (1, 2), (1, 1), (0, 0)))
    hp, wp = h + 3, wdt + 2
    xf = xp.reshape(n, hp * wp, cin)
    m = oh * wp
    wf = w_folded.astype(ACT_DTYPE).reshape(9, cin, cout)
    shift2 = shift.reshape(1, cout).astype(jnp.float32)

    out = pl.pallas_call(
        functools.partial(_conv3x3_kernel, wp=wp, m=m, relu=relu),
        out_shape=jax.ShapeDtypeStruct((n, m, cout), ACT_DTYPE),
        grid_spec=pltpu.PrefetchScalarGridSpec(
            num_scalar_prefetch=0, grid=(n,),
            in_specs=[pl.BlockSpec((1, hp * wp, cin), lambda i: (i, 0, 0)),
                      pl.BlockSpec((9, cin, cout), lambda i: (0, 0, 0)),
                      pl.BlockSpec((1, cout), lambda i: (0, 0))],
            out_specs=pl.BlockSpec((1, m, cout), lambda i: (i, 0, 0))),
        compiler_params=pltpu.CompilerParams(
            dimension_semantics=("parallel",)),
    )(xf, wf, shift2)
    # drop the 2 junk columns per output row coming from the Wp-wide layout
    return out.reshape(n, oh, wp, cout)[:, :, :ow, :]


# ----------------------------------------------------------------------------
# Pallas kernel 3: fused global average pool + final Linear(2048, 2) head.
# ----------------------------------------------------------------------------

def _pool_fc_kernel(x_ref, w_ref, b_ref, o_ref, *, inv_hw):
    # x_ref: (N, H*W, C) bf16; w_ref: (C, num_classes) f32; b_ref: (1, num_classes)
    pooled = jnp.sum(x_ref[...].astype(jnp.float32), axis=1) * inv_hw   # (N, C)
    o_ref[...] = (jnp.dot(pooled, w_ref[...],
                          preferred_element_type=jnp.float32) + b_ref[...])


def global_pool_fc(x, fc_w, fc_b):
    """x: (N,H,W,C) NHWC -> (N, num_classes) f32 logits (avgpool + FC fused)."""
    n, h, w, c = x.shape
    xf = x.astype(ACT_DTYPE).reshape(n, h * w, c)
    return pl.pallas_call(
        functools.partial(_pool_fc_kernel, inv_hw=1.0 / float(h * w)),
        out_shape=jax.ShapeDtypeStruct((n, fc_w.shape[1]), jnp.float32),
    )(xf, fc_w.astype(jnp.float32), fc_b.reshape(1, -1).astype(jnp.float32))


# ----------------------------------------------------------------------------
# Conv lowering glue (im2col for the few non-fusable convs) and pooling glue
# ----------------------------------------------------------------------------

def _im2col(x, kh, kw, stride, pad):
    """x: (N,H,W,C) NHWC -> (N*OH*OW, KH*KW*C), row order (n,oh,ow), cols (kh,kw,c)."""
    n, h, w, c = x.shape
    if kh == 1 and kw == 1 and pad == 0:
        xs = x[:, ::stride, ::stride, :]
        oh, ow = xs.shape[1], xs.shape[2]
        return xs.reshape(n * oh * ow, c), n, oh, ow
    xp = jnp.pad(x, ((0, 0), (pad, pad), (pad, pad), (0, 0)))
    oh = (h + 2 * pad - kh) // stride + 1
    ow = (w + 2 * pad - kw) // stride + 1
    cols = []
    for i in range(kh):
        for j in range(kw):
            cols.append(xp[:, i:i + stride * oh:stride, j:j + stride * ow:stride, :])
    patches = jnp.stack(cols, axis=3)          # (n, oh, ow, kh*kw, c)
    return patches.reshape(n * oh * ow, kh * kw * c), n, oh, ow


def conv_bn_act(x, w, bn, stride, pad, relu=True, residual=None):
    """Conv (no bias) + BatchNorm (eval, scale folded into weights) + residual/ReLU.
    x: NHWC bf16, w: HWIO f32, bn: (gamma, beta, running_mean, running_var)."""
    kh, kw, cin, cout = w.shape
    gamma, beta, mean, var = bn
    scale = gamma / jnp.sqrt(var + 1e-5)
    shift = beta - mean * scale
    w_folded = w * scale                       # fold BN scale into the weights

    if (kh, kw) == (3, 3) and stride == 1 and pad == 1 and residual is None:
        n, h, wdt, _ = x.shape
        if _conv3x3_fused_vmem_bytes(h + 3, wdt + 2, cin, h, cout) \
                <= _FUSED_CONV_VMEM_BUDGET:
            return conv3x3_s1_fused(x, w_folded, shift, relu=relu)

    # general path: im2col + fused matmul (stem 7x7, stride-2 3x3, all 1x1 convs;
    # the 1x1/stride-1 "im2col" is just a free reshape)
    # TODO(synk): stride-2 3x3 convs still materialize im2col patches in HBM.
    patches, n, oh, ow = _im2col(x.astype(ACT_DTYPE), kh, kw, stride, pad)
    wm = w_folded.reshape(kh * kw * cin, cout)
    res2d = None if residual is None else residual.reshape(-1, cout)
    y = fused_matmul(patches, wm, shift, residual=res2d, relu=relu)
    return y.reshape(n, oh, ow, cout)


def maxpool_3x3_s2_p1(x):
    # TODO(synk): pooling kept in JAX glue (minor cost next to the matmuls).
    n, h, w, c = x.shape
    neg = jnp.asarray(-jnp.inf, x.dtype)
    xp = jnp.pad(x, ((0, 0), (1, 1), (1, 1), (0, 0)), constant_values=-jnp.inf)
    oh = (h + 2 - 3) // 2 + 1
    ow = (w + 2 - 3) // 2 + 1
    out = jnp.full((n, oh, ow, c), neg, dtype=x.dtype)
    for i in range(3):
        for j in range(3):
            out = jnp.maximum(out, xp[:, i:i + 2 * oh:2, j:j + 2 * ow:2, :])
    return out


# ----------------------------------------------------------------------------
# ResNet-50 parameters (deterministic synthetic init) and forward pass
# ----------------------------------------------------------------------------

_BLOCK_CFG = [(64, 3, 1), (128, 4, 2), (256, 6, 2), (512, 3, 2)]  # resnet50


def _init_conv(key, kh, kw, cin, cout):
    fan_in = kh * kw * cin
    return (jax.random.normal(key, (kh, kw, cin, cout), jnp.float32)
            * math.sqrt(2.0 / fan_in))


def _init_bn(cout):
    return (jnp.ones((cout,), jnp.float32), jnp.zeros((cout,), jnp.float32),
            jnp.zeros((cout,), jnp.float32), jnp.ones((cout,), jnp.float32))


def make_img_class_params(key):
    counter = iter(range(10_000))

    def nk():
        return jax.random.fold_in(key, next(counter))

    params = {"conv1_w": _init_conv(nk(), 7, 7, 3, 64), "bn1": _init_bn(64)}
    inplanes = 64
    layers = []
    for planes, nblocks, stride in _BLOCK_CFG:
        blocks = []
        for bi in range(nblocks):
            s = stride if bi == 0 else 1
            blk = {
                "stride": s,
                "conv1_w": _init_conv(nk(), 1, 1, inplanes, planes),
                "bn1": _init_bn(planes),
                "conv2_w": _init_conv(nk(), 3, 3, planes, planes),
                "bn2": _init_bn(planes),
                "conv3_w": _init_conv(nk(), 1, 1, planes, planes * 4),
                "bn3": _init_bn(planes * 4),
            }
            if bi == 0:
                blk["ds_w"] = _init_conv(nk(), 1, 1, inplanes, planes * 4)
                blk["ds_bn"] = _init_bn(planes * 4)
            blocks.append(blk)
            inplanes = planes * 4
        layers.append(blocks)
    params["layers"] = layers
    # replacement fc: Linear(in_features=2048, out_features=2), stored as (in, out)
    params["fc_w"] = (jax.random.normal(nk(), (2048, 2), jnp.float32)
                      * (1.0 / math.sqrt(2048)))
    params["fc_b"] = jnp.zeros((2,), jnp.float32)
    return params


def _bottleneck(x, blk):
    identity = x
    out = conv_bn_act(x, blk["conv1_w"], blk["bn1"], stride=1, pad=0, relu=True)
    out = conv_bn_act(out, blk["conv2_w"], blk["bn2"], stride=blk["stride"],
                      pad=1, relu=True)
    if "ds_w" in blk:
        identity = conv_bn_act(x, blk["ds_w"], blk["ds_bn"],
                               stride=blk["stride"], pad=0, relu=False)
    # conv3 + bn3 + residual add + ReLU fused in one Pallas call
    out = conv_bn_act(out, blk["conv3_w"], blk["bn3"], stride=1, pad=0,
                      relu=True, residual=identity)
    return out


def img_class_forward(params, img_nchw):
    """img_nchw: (N, 3, H, W) float32, PyTorch layout. Returns (N, 2) f32 logits."""
    x = jnp.transpose(img_nchw, (0, 2, 3, 1)).astype(ACT_DTYPE)   # -> NHWC bf16
    x = conv_bn_act(x, params["conv1_w"], params["bn1"], stride=2, pad=3, relu=True)
    x = maxpool_3x3_s2_p1(x)
    for blocks in params["layers"]:
        for blk in blocks:
            x = _bottleneck(x, blk)
    # global avg pool + Linear(2048, 2) fused in one Pallas kernel (f32 math)
    logits = global_pool_fc(x, params["fc_w"], params["fc_b"])
    return logits


# ----------------------------------------------------------------------------
# main
# ----------------------------------------------------------------------------

if __name__ == "__main__":
    key = jax.random.PRNGKey(0)
    params = make_img_class_params(key)
    # small but architecture-consistent input: batch=2, 3 channels, 32x32
    img = jax.random.normal(jax.random.fold_in(key, 12345),
                            (2, 3, 32, 32), jnp.float32)
    logits = img_class_forward(params, img)
    logits = jax.block_until_ready(logits)
    assert logits.shape == (2, 2) and logits.dtype == jnp.float32
    assert bool(jnp.all(jnp.isfinite(logits)))
    print("KERNEL_OK")
</pallas_src>

<mosaic_0001>
module attributes {stable_mosaic.version = 11 : i64} {
  func.func @_mm_kernel(%arg0: i32, %arg1: i32, %arg2: i32, %arg3: memref<512x147xbf16, #tpu.memory_space<vmem>>, %arg4: memref<147x64xbf16, #tpu.memory_space<vmem>>, %arg5: memref<1x64xf32, #tpu.memory_space<vmem>>, %arg6: memref<512x64xbf16, #tpu.memory_space<vmem>>, %arg7: memref<512x64xf32, #tpu.memory_space<vmem>>) attributes {dimension_semantics = [#tpu.dimension_semantics<parallel>, #tpu.dimension_semantics<parallel>, #tpu.dimension_semantics<arbitrary>], iteration_bounds = array<i64: 1, 1, 1>, scalar_prefetch = 0 : i64, scratch_operands = 1 : i64, tpu.core_type = #tpu.core_type<tc>, window_params = [{transform_indices = @transform_0, window_bounds = array<i64: 512, 147>}, {transform_indices = @transform_1, window_bounds = array<i64: 147, 64>}, {transform_indices = @transform_2, window_bounds = array<i64: 1, 64>}, {transform_indices = @transform_3, window_bounds = array<i64: 512, 64>}]} {
    %c0_i32 = arith.constant 0 : i32
    %0 = arith.cmpi eq, %arg2, %c0_i32 : i32
    %1 = arith.extui %0 : i1 to i32
    %c0_i32_0 = arith.constant 0 : i32
    %2 = arith.cmpi ne, %1, %c0_i32_0 : i32
    scf.if %2 {
      %cst_10 = arith.constant 0.000000e+00 : f32
      %12 = vector.broadcast %cst_10 : f32 to vector<512x64xf32>
      %c0_11 = arith.constant 0 : index
      %c0_12 = arith.constant 0 : index
      %13 = vector.load %arg7[%c0_11, %c0_12] : memref<512x64xf32, #tpu.memory_space<vmem>>, vector<512x64xf32>
      tpu.vector_store %arg7[%c0_11, %c0_12], %12 {strides = array<i32>} : memref<512x64xf32, #tpu.memory_space<vmem>>, vector<512x64xf32>,
    } else {
    }
    %c0 = arith.constant 0 : index
    %c0_1 = arith.constant 0 : index
    %3 = vector.load %arg7[%c0, %c0_1] : memref<512x64xf32, #tpu.memory_space<vmem>>, vector<512x64xf32>
    %c0_2 = arith.constant 0 : index
    %c0_3 = arith.constant 0 : index
    %4 = vector.load %arg3[%c0_2, %c0_3] : memref<512x147xbf16, #tpu.memory_space<vmem>>, vector<512x147xbf16>
    %c0_4 = arith.constant 0 : index
    %c0_5 = arith.constant 0 : index
    %5 = vector.load %arg4[%c0_4, %c0_5] : memref<147x64xbf16, #tpu.memory_space<vmem>>, vector<147x64xbf16>
    %cst = arith.constant dense<0.000000e+00> : vector<512x64xf32>
    %6 = tpu.matmul %4, %5, %cst {dimension_numbers = #tpu.dot_dimension_numbers<[1], [0], [0], [1], [0, 0, 1, 1], [], []>} : vector<512x147xbf16>, vector<147x64xbf16>, vector<512x64xf32> -> vector<512x64xf32>
    %7 = arith.addf %3, %6 : vector<512x64xf32>
    %c0_6 = arith.constant 0 : index
    %c0_7 = arith.constant 0 : index
    %8 = vector.load %arg7[%c0_6, %c0_7] : memref<512x64xf32, #tpu.memory_space<vmem>>, vector<512x64xf32>
    tpu.vector_store %arg7[%c0_6, %c0_7], %7 {strides = array<i32>} : memref<512x64xf32, #tpu.memory_space<vmem>>, vector<512x64xf32>,
    %c0_i32_8 = arith.constant 0 : i32
    %9 = arith.cmpi eq, %arg2, %c0_i32_8 : i32
    %10 = arith.extui %9 : i1 to i32
    %c0_i32_9 = arith.constant 0 : i32
    %11 = arith.cmpi ne, %10, %c0_i32_9 : i32
    scf.if %11 {
      %c0_10 = arith.constant 0 : index
      %c0_11 = arith.constant 0 : index
      %12 = vector.load %arg7[%c0_10, %c0_11] : memref<512x64xf32, #tpu.memory_space<vmem>>, vector<512x64xf32>
      %c0_12 = arith.constant 0 : index
      %c0_13 = arith.constant 0 : index
      %13 = vector.load %arg5[%c0_12, %c0_13] : memref<1x64xf32, #tpu.memory_space<vmem>>, vector<1x64xf32>
      %14 = vector.broadcast %13 : vector<1x64xf32> to vector<512x64xf32>
      %15 = arith.addf %12, %14 : vector<512x64xf32>
      %cst_14 = arith.constant 0.000000e+00 : f32
      %16 = vector.broadcast %cst_14 : f32 to vector<512x64xf32>
      %17 = arith.maximumf %15, %16 : vector<512x64xf32>
      %18 = arith.truncf %17 : vector<512x64xf32> to vector<512x64xbf16>
      %c0_15 = arith.constant 0 : index
      %c0_16 = arith.constant 0 : index
      %19 = vector.load %arg6[%c0_15, %c0_16] : memref<512x64xbf16, #tpu.memory_space<vmem>>, vector<512x64xbf16>
      tpu.vector_store %arg6[%c0_15, %c0_16], %18 {strides = array<i32>} : memref<512x64xbf16, #tpu.memory_space<vmem>>, vector<512x64xbf16>,
    } else {
    }
    return
  }
  func.func @transform_0(%arg0: i32, %arg1: i32, %arg2: i32) -> (i32, i32) {
    %c0_i32 = arith.constant 0 : i32
    return %arg0, %arg2 : i32, i32
  }
  func.func @transform_1(%arg0: i32, %arg1: i32, %arg2: i32) -> (i32, i32) {
    %c0_i32 = arith.constant 0 : i32
    return %arg2, %arg1 : i32, i32
  }
  func.func @transform_2(%arg0: i32, %arg1: i32, %arg2: i32) -> (i32, i32) {
    %c0_i32 = arith.constant 0 : i32
    %c0_i32_0 = arith.constant 0 : i32
    return %c0_i32, %arg1 : i32, i32
  }
  func.func @transform_3(%arg0: i32, %arg1: i32, %arg2: i32) -> (i32, i32) {
    %c0_i32 = arith.constant 0 : i32
    return %arg0, %arg1 : i32, i32
  }
}

</mosaic_0001>

<bundles_post_ra>
// kernel: tpu_custom_call.1
= control target key start
LH: loop header
LB: loop body
LE: loop exit
PB: predicated region body
PF: predicated region fallthrough
CT: control target
= control target key end

     0   :  { %v1990_v0 = vmov 0   ;;  %vm576_vm0 = vcmask 154624   ;;  %vm673_vm1 = vcmask 1040384   ;;  %vm674_vm2 = vcmask 1041408   ;;  %s2793_s1 = inlined_call_operand.vmem [shape: bf16[147,64], index: 1, kind: input, shape index: {}]   ;;  %s2794_s0 = inlined_call_operand.vmem [shape: bf16[512,147], index: 0, kind: input, shape index: {}]   ;;  %s2795_s2 = inlined_call_operand.vmem [shape: f32[1,64], index: 2, kind: input, shape index: {}]   ;;  %s2796_s3 = inlined_call_operand.vmem [shape: bf16[512,64], index: 3, kind: output, shape index: {}]  }
   0x1   :  { %680 = vmatprep.subr.bf16.mxu0 %v1990_v0  ;;  %1860 = vmatprep.subr.bf16.mxu1 %v1990_v0  ;;  %v1883_v1 = vld [vmem:[%s2793_s1] sm:$0xff]   ;;  %v1884_v2 = vld [vmem:[%s2793_s1 + $0x8] sm:$0xff]   ;;  %v1885_v3 = vld [vmem:[%s2793_s1 + $0x10] sm:$0xff]   ;;  %v1991_v11 = vmov 65535   ;;  %vm19_vm3 = vcmask 523264   ;;  %v1992_v17 = vmov 0.0  }
   0x2   :  { %681 = vmatpush1.bf16.msra.mxu0 %v1883_v1  ;;  %1870 = vmatpush1.bf16.msra.mxu1 %v1883_v1  ;;  %v1886_v4 = vld [vmem:[%s2793_s1 + $0x18] sm:$0xff]   ;;  %v1895_v5 = vld [vmem:[%s2794_s0 + $0x4] ss:$8 sps:$4 sm:$0xff]   ;;  %v1889_v9 = vld [vmem:[%s2793_s1 + $0x30] sm:$0xff]   ;;  %v675_v12 = vsel %vm673_vm1, 4294967295, %v1991_v11  ;;  %20 = vst.msk [vmem:[#allocation2] sm:$0xff] %vm19_vm3, %v1992_v17 }
   0x3   :  { %682 = vmatprep.subr.bf16.mxu0 %v1990_v0  ;;  %1861 = vmatprep.subr.bf16.mxu1 %v1990_v0  ;;  %v1898_v6 = vld [vmem:[%s2794_s0 + $0x104] ss:$8 sps:$4 sm:$0xff]   ;;  %v1890_v10 = vld [vmem:[%s2793_s1 + $0x38] sm:$0xff]   ;;  %v1892_v14 = vld [vmem:[%s2793_s1 + $0x48] ss:$0 sps:$4 sm:$0x33]  }
   0x4   :  { %1699 = vmatprep.mubr.msk.bf16.mxu0 %vm576_vm0, %v1895_v5  ;;  %v1887_v7 = vld [vmem:[%s2793_s1 + $0x20] sm:$0xff]   ;;  %1715 = vmatprep.mubr.msk.bf16.mxu1 %vm576_vm0, %v1898_v6  ;;  %v1888_v8 = vld [vmem:[%s2793_s1 + $0x28] sm:$0xff]   ;;  %v676_v15 = vsel %vm674_vm2, %v675_v12, 0  ;;  %21 = vst.msk [vmem:[#allocation2 + $0x8] sm:$0xff] %vm19_vm3, %v1992_v17  ;;  %22 = vst.msk [vmem:[#allocation2 + $0x10] sm:$0xff] %vm19_vm3, %v1992_v17  ;;  %vm1556_vm4 = vcmask 519168  }
   0x5   :  { %v1891_v13 = vld [vmem:[%s2793_s1 + $0x40] sm:$0xff]   ;;  %v2051_v16 = vand.u32 %v1892_v14, %v676_v15  ;;  %23 = vst.msk [vmem:[#allocation2 + $0x18] sm:$0xff] %vm19_vm3, %v1992_v17  ;;  %24 = vst.msk [vmem:[#allocation2 + $0x20] sm:$0xff] %vm19_vm3, %v1992_v17  ;;  %v1899_v20 = vld [vmem:[%s2794_s0 + $0x14] ss:$8 sps:$4 sm:$0xff]  }
   0x6   :  { %683 = vmatpush1.bf16.msra.mxu0 %v1884_v2  ;;  %1871 = vmatpush1.bf16.msra.mxu1 %v1884_v2  ;;  %25 = vst.msk [vmem:[#allocation2 + $0x28] sm:$0xff] %vm19_vm3, %v1992_v17  ;;  %26 = vst.msk [vmem:[#allocation2 + $0x30] sm:$0xff] %vm19_vm3, %v1992_v17  ;;  %v1893_v18 = vld [vmem:[%s2794_s0] ss:$8 sps:$4 sm:$0xff]   ;;  %v1901_v21 = vld [vmem:[%s2794_s0 + $0x114] ss:$8 sps:$4 sm:$0xff]  }
   0x7   :  { %684 = vmatprep.subr.bf16.mxu0 %v1990_v0  ;;  %1862 = vmatprep.subr.bf16.mxu1 %v1990_v0  ;;  %27 = vst.msk [vmem:[#allocation2 + $0x38] sm:$0xff] %vm19_vm3, %v1992_v17  ;;  %28 = vst.msk [vmem:[#allocation2 + $0x40] sm:$0xff] %vm19_vm3, %v1992_v17  ;;  %v1896_v19 = vld [vmem:[%s2794_s0 + $0x100] ss:$8 sps:$4 sm:$0xff]   ;;  %v1903_v22 = vld [vmem:[%s2794_s0 + $0x10] ss:$8 sps:$4 sm:$0xff]  }
   0x8   :  { %29 = vst.msk [vmem:[#allocation2 + $0x48] sm:$0xff] %vm19_vm3, %v1992_v17  ;;  %30 = vst.msk [vmem:[#allocation2 + $0x50] sm:$0xff] %vm19_vm3, %v1992_v17  ;;  %v1904_v23 = vld [vmem:[%s2794_s0 + $0x110] ss:$8 sps:$4 sm:$0xff]   ;;  %v1905_v24 = vld [vmem:[%s2794_s0 + $0x24] ss:$8 sps:$4 sm:$0xff]  }
   0x9   :  { %31 = vst.msk [vmem:[#allocation2 + $0x58] sm:$0xff] %vm19_vm3, %v1992_v17  ;;  %32 = vst.msk [vmem:[#allocation2 + $0x60] sm:$0xff] %vm19_vm3, %v1992_v17  ;;  %v1907_v25 = vld [vmem:[%s2794_s0 + $0x124] ss:$8 sps:$4 sm:$0xff]   ;;  %v1909_v26 = vld [vmem:[%s2794_s0 + $0x20] ss:$8 sps:$4 sm:$0xff]  }
   0xa   :  { %685 = vmatpush1.bf16.msra.mxu0 %v1885_v3  ;;  %1872 = vmatpush1.bf16.msra.mxu1 %v1885_v3  ;;  %33 = vst.msk [vmem:[#allocation2 + $0x68] sm:$0xff] %vm19_vm3, %v1992_v17  ;;  %34 = vst.msk [vmem:[#allocation2 + $0x70] sm:$0xff] %vm19_vm3, %v1992_v17  ;;  %v1910_v27 = vld [vmem:[%s2794_s0 + $0x120] ss:$8 sps:$4 sm:$0xff]   ;;  %v1911_v28 = vld [vmem:[%s2794_s0 + $0x34] ss:$8 sps:$4 sm:$0xff]  }
   0xb   :  { %686 = vmatprep.subr.bf16.mxu0 %v1990_v0  ;;  %1863 = vmatprep.subr.bf16.mxu1 %v1990_v0  ;;  %35 = vst.msk [vmem:[#allocation2 + $0x78] sm:$0xff] %vm19_vm3, %v1992_v17  ;;  %36 = vst.msk [vmem:[#allocation2 + $0x80] sm:$0xff] %vm19_vm3, %v1992_v17  ;;  %v1913_v29 = vld [vmem:[%s2794_s0 + $0x134] ss:$8 sps:$4 sm:$0xff]   ;;  %v1915_v30 = vld [vmem:[%s2794_s0 + $0x30] ss:$8 sps:$4 sm:$0xff]  }
   0xc   :  { %37 = vst.msk [vmem:[#allocation2 + $0x88] sm:$0xff] %vm19_vm3, %v1992_v17  ;;  %38 = vst.msk [vmem:[#allocation2 + $0x90] sm:$0xff] %vm19_vm3, %v1992_v17  ;;  %v1916_v31 = vld [vmem:[%s2794_s0 + $0x130] ss:$8 sps:$4 sm:$0xff]   ;;  %v1917_v32 = vld [vmem:[%s2794_s0 + $0x44] ss:$8 sps:$4 sm:$0xff]  }
   0xd   :  { %39 = vst.msk [vmem:[#allocation2 + $0x98] sm:$0xff] %vm19_vm3, %v1992_v17  ;;  %40 = vst.msk [vmem:[#allocation2 + $0xa0] sm:$0xff] %vm19_vm3, %v1992_v17  ;;  %v1919_v33 = vld [vmem:[%s2794_s0 + $0x144] ss:$8 sps:$4 sm:$0xff]   ;;  %v1921_v34 = vld [vmem:[%s2794_s0 + $0x40] ss:$8 sps:$4 sm:$0xff]  }
   0xe   :  { %687 = vmatpush1.bf16.msra.mxu0 %v1886_v4  ;;  %1873 = vmatpush1.bf16.msra.mxu1 %v1886_v4  ;;  %41 = vst.msk [vmem:[#allocation2 + $0xa8] sm:$0xff] %vm19_vm3, %v1992_v17  ;;  %42 = vst.msk [vmem:[#allocation2 + $0xb0] sm:$0xff] %vm19_vm3, %v1992_v17  ;;  %v1922_v35 = vld [vmem:[%s2794_s0 + $0x140] ss:$8 sps:$4 sm:$0xff]   ;;  %v1923_v36 = vld [vmem:[%s2794_s0 + $0x54] ss:$8 sps:$4 sm:$0xff]  }
   0xf   :  { %688 = vmatprep.subr.bf16.mxu0 %v1990_v0  ;;  %1864 = vmatprep.subr.bf16.mxu1 %v1990_v0  ;;  %43 = vst.msk [vmem:[#allocation2 + $0xb8] sm:$0xff] %vm19_vm3, %v1992_v17  ;;  %44 = vst.msk [vmem:[#allocation2 + $0xc0] sm:$0xff] %vm19_vm3, %v1992_v17  ;;  %v1925_v37 = vld [vmem:[%s2794_s0 + $0x154] ss:$8 sps:$4 sm:$0xff]   ;;  %v1927_v38 = vld [vmem:[%s2794_s0 + $0x50] ss:$8 sps:$4 sm:$0xff]  }
  0x10   :  { %45 = vst.msk [vmem:[#allocation2 + $0xc8] sm:$0xff] %vm19_vm3, %v1992_v17  ;;  %46 = vst.msk [vmem:[#allocation2 + $0xd0] sm:$0xff] %vm19_vm3, %v1992_v17  ;;  %v1928_v39 = vld [vmem:[%s2794_s0 + $0x150] ss:$8 sps:$4 sm:$0xff]   ;;  %v1929_v40 = vld [vmem:[%s2794_s0 + $0x64] ss:$8 sps:$4 sm:$0xff]  }
  0x11   :  { %47 = vst.msk [vmem:[#allocation2 + $0xd8] sm:$0xff] %vm19_vm3, %v1992_v17  ;;  %48 = vst.msk [vmem:[#allocation2 + $0xe0] sm:$0xff] %vm19_vm3, %v1992_v17  ;;  %v1931_v41 = vld [vmem:[%s2794_s0 + $0x164] ss:$8 sps:$4 sm:$0xff]   ;;  %v1933_v42 = vld [vmem:[%s2794_s0 + $0x60] ss:$8 sps:$4 sm:$0xff]  }
  0x12   :  { %689 = vmatpush1.bf16.msra.mxu0 %v1887_v7  ;;  %1874 = vmatpush1.bf16.msra.mxu1 %v1887_v7  ;;  %49 = vst.msk [vmem:[#allocation2 + $0xe8] sm:$0xff] %vm19_vm3, %v1992_v17  ;;  %50 = vst.msk [vmem:[#allocation2 + $0xf0] sm:$0xff] %vm19_vm3, %v1992_v17  ;;  %v1934_v43 = vld [vmem:[%s2794_s0 + $0x160] ss:$8 sps:$4 sm:$0xff]   ;;  %v1935_v44 = vld [vmem:[%s2794_s0 + $0x74] ss:$8 sps:$4 sm:$0xff]  }
  0x13   :  { %690 = vmatprep.subr.bf16.mxu0 %v1990_v0  ;;  %1865 = vmatprep.subr.bf16.mxu1 %v1990_v0  ;;  %51 = vst.msk [vmem:[#allocation2 + $0xf8] sm:$0xff] %vm19_vm3, %v1992_v17  ;;  %52 = vst.msk [vmem:[#allocation2 + $0x100] sm:$0xff] %vm19_vm3, %v1992_v17  ;;  %v1937_v45 = vld [vmem:[%s2794_s0 + $0x174] ss:$8 sps:$4 sm:$0xff]   ;;  %v1939_v46 = vld [vmem:[%s2794_s0 + $0x70] ss:$8 sps:$4 sm:$0xff]  }
  0x14   :  { %53 = vst.msk [vmem:[#allocation2 + $0x108] sm:$0xff] %vm19_vm3, %v1992_v17  ;;  %54 = vst.msk [vmem:[#allocation2 + $0x110] sm:$0xff] %vm19_vm3, %v1992_v17  ;;  %v1940_v47 = vld [vmem:[%s2794_s0 + $0x170] ss:$8 sps:$4 sm:$0xff]   ;;  %v1941_v48 = vld [vmem:[%s2794_s0 + $0x84] ss:$8 sps:$4 sm:$0xff]  }
  0x15   :  { %55 = vst.msk [vmem:[#allocation2 + $0x118] sm:$0xff] %vm19_vm3, %v1992_v17  ;;  %56 = vst.msk [vmem:[#allocation2 + $0x120] sm:$0xff] %vm19_vm3, %v1992_v17  ;;  %v1943_v49 = vld [vmem:[%s2794_s0 + $0x184] ss:$8 sps:$4 sm:$0xff]   ;;  %v1945_v50 = vld [vmem:[%s2794_s0 + $0x80] ss:$8 sps:$4 sm:$0xff]  }
  0x16   :  { %691 = vmatpush1.bf16.msra.mxu0 %v1888_v8  ;;  %1875 = vmatpush1.bf16.msra.mxu1 %v1888_v8  ;;  %57 = vst.msk [vmem:[#allocation2 + $0x128] sm:$0xff] %vm19_vm3, %v1992_v17  ;;  %58 = vst.msk [vmem:[#allocation2 + $0x130] sm:$0xff] %vm19_vm3, %v1992_v17  ;;  %v1946_v51 = vld [vmem:[%s2794_s0 + $0x180] ss:$8 sps:$4 sm:$0xff]   ;;  %v1947_v52 = vld [vmem:[%s2794_s0 + $0x94] ss:$8 sps:$4 sm:$0xff]  }
  0x17   :  { %692 = vmatprep.subr.bf16.mxu0 %v1990_v0  ;;  %1866 = vmatprep.subr.bf16.mxu1 %v1990_v0  ;;  %59 = vst.msk [vmem:[#allocation2 + $0x138] sm:$0xff] %vm19_vm3, %v1992_v17  ;;  %60 = vst.msk [vmem:[#allocation2 + $0x140] sm:$0xff] %vm19_vm3, %v1992_v17  ;;  %v1949_v53 = vld [vmem:[%s2794_s0 + $0x194] ss:$8 sps:$4 sm:$0xff]   ;;  %v1951_v54 = vld [vmem:[%s2794_s0 + $0x90] ss:$8 sps:$4 sm:$0xff]  }
  0x18   :  { %61 = vst.msk [vmem:[#allocation2 + $0x148] sm:$0xff] %vm19_vm3, %v1992_v17  ;;  %62 = vst.msk [vmem:[#allocation2 + $0x150] sm:$0xff] %vm19_vm3, %v1992_v17  ;;  %v1952_v55 = vld [vmem:[%s2794_s0 + $0x190] ss:$8 sps:$4 sm:$0xff]   ;;  %v1953_v56 = vld [vmem:[%s2794_s0 + $0xa4] ss:$8 sps:$4 sm:$0xff]  }
  0x19   :  { %63 = vst.msk [vmem:[#allocation2 + $0x158] sm:$0xff] %vm19_vm3, %v1992_v17  ;;  %64 = vst.msk [vmem:[#allocation2 + $0x160] sm:$0xff] %vm19_vm3, %v1992_v17  ;;  %v1955_v57 = vld [vmem:[%s2794_s0 + $0x1a4] ss:$8 sps:$4 sm:$0xff]   ;;  %v1957_v58 = vld [vmem:[%s2794_s0 + $0xa0] ss:$8 sps:$4 sm:$0xff]  }
  0x1a   :  { %693 = vmatpush1.bf16.msra.mxu0 %v1889_v9  ;;  %1876 = vmatpush1.bf16.msra.mxu1 %v1889_v9  ;;  %65 = vst.msk [vmem:[#allocation2 + $0x168] sm:$0xff] %vm19_vm3, %v1992_v17  ;;  %66 = vst.msk [vmem:[#allocation2 + $0x170] sm:$0xff] %vm19_vm3, %v1992_v17  ;;  %v1958_v59 = vld [vmem:[%s2794_s0 + $0x1a0] ss:$8 sps:$4 sm:$0xff]   ;;  %v1959_v60 = vld [vmem:[%s2794_s0 + $0xb4] ss:$8 sps:$4 sm:$0xff]  }
  0x1b   :  { %694 = vmatprep.subr.bf16.mxu0 %v1990_v0  ;;  %1867 = vmatprep.subr.bf16.mxu1 %v1990_v0  ;;  %67 = vst.msk [vmem:[#allocation2 + $0x178] sm:$0xff] %vm19_vm3, %v1992_v17  ;;  %68 = vst.msk [vmem:[#allocation2 + $0x180] sm:$0xff] %vm19_vm3, %v1992_v17  ;;  %v1961_v61 = vld [vmem:[%s2794_s0 + $0x1b4] ss:$8 sps:$4 sm:$0xff]   ;;  %v1963_v62 = vld [vmem:[%s2794_s0 + $0xb0] ss:$8 sps:$4 sm:$0xff]  }
  0x1c   :  { %69 = vst.msk [vmem:[#allocation2 + $0x188] sm:$0xff] %vm19_vm3, %v1992_v17  ;;  %70 = vst.msk [vmem:[#allocation2 + $0x190] sm:$0xff] %vm19_vm3, %v1992_v17  ;;  %v1964_v63 = vld [vmem:[%s2794_s0 + $0x1b0] ss:$8 sps:$4 sm:$0xff]   ;;  %v1967_v1 = vld [vmem:[%s2794_s0 + $0x1c4] ss:$8 sps:$4 sm:$0xff]  }
  0x1d   :  { %71 = vst.msk [vmem:[#allocation2 + $0x198] sm:$0xff] %vm19_vm3, %v1992_v17  ;;  %72 = vst.msk [vmem:[#allocation2 + $0x1a0] sm:$0xff] %vm19_vm3, %v1992_v17  ;;  %v1969_v2 = vld [vmem:[%s2794_s0 + $0xc0] ss:$8 sps:$4 sm:$0xff]   ;;  %v1971_v4 = vld [vmem:[%s2794_s0 + $0xd4] ss:$8 sps:$4 sm:$0xff]  }
  0x1e   :  { %695 = vmatpush1.bf16.msra.mxu0 %v1890_v10  ;;  %1877 = vmatpush1.bf16.msra.mxu1 %v1890_v10  ;;  %73 = vst.msk [vmem:[#allocation2 + $0x1a8] sm:$0xff] %vm19_vm3, %v1992_v17  ;;  %74 = vst.msk [vmem:[#allocation2 + $0x1b0] sm:$0xff] %vm19_vm3, %v1992_v17  ;;  %v1970_v3 = vld [vmem:[%s2794_s0 + $0x1c0] ss:$8 sps:$4 sm:$0xff]   ;;  %v1973_v5 = vld [vmem:[%s2794_s0 + $0x1d4] ss:$8 sps:$4 sm:$0xff]  }
  0x1f   :  { %696 = vmatprep.subr.bf16.mxu0 %v1990_v0  ;;  %1868 = vmatprep.subr.bf16.mxu1 %v1990_v0  ;;  %75 = vst.msk [vmem:[#allocation2 + $0x1b8] sm:$0xff] %vm19_vm3, %v1992_v17  ;;  %76 = vst.msk [vmem:[#allocation2 + $0x1c0] sm:$0xff] %vm19_vm3, %v1992_v17  ;;  %v1975_v6 = vld [vmem:[%s2794_s0 + $0xd0] ss:$8 sps:$4 sm:$0xff]   ;;  %v1977_v8 = vld [vmem:[%s2794_s0 + $0xe4] ss:$8 sps:$4 sm:$0xff]  }
  0x20   :  { %77 = vst.msk [vmem:[#allocation2 + $0x1c8] sm:$0xff] %vm19_vm3, %v1992_v17  ;;  %78 = vst.msk [vmem:[#allocation2 + $0x1d0] sm:$0xff] %vm19_vm3, %v1992_v17  ;;  %v1976_v7 = vld [vmem:[%s2794_s0 + $0x1d0] ss:$8 sps:$4 sm:$0xff]   ;;  %v1979_v9 = vld [vmem:[%s2794_s0 + $0x1e4] ss:$8 sps:$4 sm:$0xff]  }
  0x21   :  { %79 = vst.msk [vmem:[#allocation2 + $0x1d8] sm:$0xff] %vm19_vm3, %v1992_v17  ;;  %80 = vst.msk [vmem:[#allocation2 + $0x1e0] sm:$0xff] %vm19_vm3, %v1992_v17  ;;  %v1981_v10 = vld [vmem:[%s2794_s0 + $0xe0] ss:$8 sps:$4 sm:$0xff]   ;;  %v1983_v12 = vld [vmem:[%s2794_s0 + $0xf4] ss:$8 sps:$4 sm:$0xff]  }
  0x22   :  { %697 = vmatpush1.bf16.msra.mxu0 %v1891_v13  ;;  %1878 = vmatpush1.bf16.msra.mxu1 %v1891_v13  ;;  %81 = vst.msk [vmem:[#allocation2 + $0x1e8] sm:$0xff] %vm19_vm3, %v1992_v17  ;;  %82 = vst.msk [vmem:[#allocation2 + $0x1f0] sm:$0xff] %vm19_vm3, %v1992_v17  ;;  %v1982_v11 = vld [vmem:[%s2794_s0 + $0x1e0] ss:$8 sps:$4 sm:$0xff]   ;;  %v1985_v13 = vld [vmem:[%s2794_s0 + $0x1f4] ss:$8 sps:$4 sm:$0xff]  }
  0x23   :  { %698 = vmatprep.subr.bf16.mxu0 %v1990_v0  ;;  %1869 = vmatprep.subr.bf16.mxu1 %v1990_v0  ;;  %83 = vst.msk [vmem:[#allocation2 + $0x1f8] sm:$0xff] %vm19_vm3, %v1992_v17  ;;  %v1965_v0 = vld [vmem:[%s2794_s0 + $0xc4] ss:$8 sps:$4 sm:$0xff]   ;;  %v1987_v14 = vld [vmem:[%s2794_s0 + $0xf0] ss:$8 sps:$4 sm:$0xff]  }
  0x24   :  { %v1988_v15 = vld [vmem:[%s2794_s0 + $0x1f0] ss:$8 sps:$4 sm:$0xff]   ;;  %v116_v17 = vld [vmem:[#allocation2 + $0x100] sm:$0xff] }
  0x26   :  { %699 = vmatpush1.bf16.msra.mxu0 %v2051_v16  ;;  %1879 = vmatpush1.bf16.msra.mxu1 %v2051_v16  ;;  %v84_v16 = vld [vmem:[#allocation2] sm:$0xff] }
  0x29   :  { %713 = vmatmul.mubr.bf16.vlgmr.msra.gmra.mrb[0].mxu0 %v1893_v18  ;;  %841 = vmatmul.mubr.bf16.vlgmr.msra.gmra.mrb[0].mxu1 %v1896_v19 }
  0x2a   :  { %1700 = vmatprep.mubr.msk.bf16.mxu0 %vm576_vm0, %v1899_v20  ;;  %1716 = vmatprep.mubr.msk.bf16.mxu1 %vm576_vm0, %v1901_v21  ;;  %v85_v20 = vld [vmem:[#allocation2 + $0x8] sm:$0xff] }
  0x2b   :  { %v117_v21 = vld [vmem:[#allocation2 + $0x108] sm:$0xff] }
  0x31   :  { %721 = vmatmul.mubr.bf16.gmra.mrb[4].mxu0 %v1903_v22  ;;  %849 = vmatmul.mubr.bf16.gmra.mrb[4].mxu1 %v1904_v23 }
  0x32   :  { %1701 = vmatprep.mubr.msk.bf16.mxu0 %vm576_vm0, %v1905_v24  ;;  %1717 = vmatprep.mubr.msk.bf16.mxu1 %vm576_vm0, %v1907_v25 }
  0x39   :  { %729 = vmatmul.mubr.bf16.gmra.mrb[8].mxu0 %v1909_v26  ;;  %857 = vmatmul.mubr.bf16.gmra.mrb[8].mxu1 %v1910_v27 }
  0x3a   :  { %1702 = vmatprep.mubr.msk.bf16.mxu0 %vm576_vm0, %v1911_v28  ;;  %1718 = vmatprep.mubr.msk.bf16.mxu1 %vm576_vm0, %v1913_v29 }
  0x41   :  { %737 = vmatmul.mubr.bf16.gmra.mrb[12].mxu0 %v1915_v30  ;;  %865 = vmatmul.mubr.bf16.gmra.mrb[12].mxu1 %v1916_v31 }
  0x42   :  { %1703 = vmatprep.mubr.msk.bf16.mxu0 %vm576_vm0, %v1917_v32  ;;  %1719 = vmatprep.mubr.msk.bf16.mxu1 %vm576_vm0, %v1919_v33  ;;  %v86_v32 = vld [vmem:[#allocation2 + $0x10] sm:$0xff] }
  0x43   :  { %v118_v33 = vld [vmem:[#allocation2 + $0x110] sm:$0xff] }
  0x49   :  { %745 = vmatmul.mubr.bf16.gmra.mrb[16].mxu0 %v1921_v34  ;;  %873 = vmatmul.mubr.bf16.gmra.mrb[16].mxu1 %v1922_v35  ;;  %v2406_v34 = vld [vmem:[%s2795_s2] ss:$0 sm:$0xff] }
  0x4a   :  { %1704 = vmatprep.mubr.msk.bf16.mxu0 %vm576_vm0, %v1923_v36  ;;  %1720 = vmatprep.mubr.msk.bf16.mxu1 %vm576_vm0, %v1925_v37  ;;  %v87_v37 = vld [vmem:[#allocation2 + $0x18] sm:$0xff] }
  0x51   :  { %753 = vmatmul.mubr.bf16.gmra.mrb[20].mxu0 %v1927_v38  ;;  %881 = vmatmul.mubr.bf16.gmra.mrb[20].mxu1 %v1928_v39  ;;  %v119_v38 = vld [vmem:[#allocation2 + $0x118] sm:$0xff] }
  0x52   :  { %1705 = vmatprep.mubr.msk.bf16.mxu0 %vm576_vm0, %v1929_v40  ;;  %1721 = vmatprep.mubr.msk.bf16.mxu1 %vm576_vm0, %v1931_v41 }
  0x59   :  { %761 = vmatmul.mubr.bf16.gmra.mrb[24].mxu0 %v1933_v42  ;;  %889 = vmatmul.mubr.bf16.gmra.mrb[24].mxu1 %v1934_v43 }
  0x5a   :  { %1706 = vmatprep.mubr.msk.bf16.mxu0 %vm576_vm0, %v1935_v44  ;;  %1722 = vmatprep.mubr.msk.bf16.mxu1 %vm576_vm0, %v1937_v45 }
  0x61   :  { %769 = vmatmul.mubr.bf16.gmra.mrb[28].mxu0 %v1939_v46  ;;  %897 = vmatmul.mubr.bf16.gmra.mrb[28].mxu1 %v1940_v47 }
  0x62   :  { %1707 = vmatprep.mubr.msk.bf16.mxu0 %vm576_vm0, %v1941_v48  ;;  %1723 = vmatprep.mubr.msk.bf16.mxu1 %vm576_vm0, %v1943_v49 }
  0x69   :  { %777 = vmatmul.mubr.bf16.gmra.mrb[32].mxu0 %v1945_v50  ;;  %905 = vmatmul.mubr.bf16.gmra.mrb[32].mxu1 %v1946_v51 }
  0x6a   :  { %1708 = vmatprep.mubr.msk.bf16.mxu0 %vm576_vm0, %v1947_v52  ;;  %1724 = vmatprep.mubr.msk.bf16.mxu1 %vm576_vm0, %v1949_v53 }
  0x71   :  { %785 = vmatmul.mubr.bf16.gmra.mrb[36].mxu0 %v1951_v54  ;;  %913 = vmatmul.mubr.bf16.gmra.mrb[36].mxu1 %v1952_v55 }
  0x72   :  { %1709 = vmatprep.mubr.msk.bf16.mxu0 %vm576_vm0, %v1953_v56  ;;  %1725 = vmatprep.mubr.msk.bf16.mxu1 %vm576_vm0, %v1955_v57 }
  0x79   :  { %793 = vmatmul.mubr.bf16.gmra.mrb[40].mxu0 %v1957_v58  ;;  %921 = vmatmul.mubr.bf16.gmra.mrb[40].mxu1 %v1958_v59  ;;  %v88_v59 = vld [vmem:[#allocation2 + $0x20] sm:$0xff] }
  0x7a   :  { %1710 = vmatprep.mubr.msk.bf16.mxu0 %vm576_vm0, %v1959_v60  ;;  %1726 = vmatprep.mubr.msk.bf16.mxu1 %vm576_vm0, %v1961_v61  ;;  %v120_v60 = vld [vmem:[#allocation2 + $0x120] sm:$0xff] }
  0x81   :  { %801 = vmatmul.mubr.bf16.gmra.mrb[44].mxu0 %v1963_v62  ;;  %929 = vmatmul.mubr.bf16.gmra.mrb[44].mxu1 %v1964_v63 }
  0x82   :  { %1711 = vmatprep.mubr.msk.bf16.mxu0 %vm576_vm0, %v1965_v0  ;;  %1727 = vmatprep.mubr.msk.bf16.mxu1 %vm576_vm0, %v1967_v1 }
  0x89   :  { %809 = vmatmul.mubr.bf16.gmra.mrb[48].mxu0 %v1969_v2  ;;  %937 = vmatmul.mubr.bf16.gmra.mrb[48].mxu1 %v1970_v3  ;;  %v89_v3 = vld [vmem:[#allocation2 + $0x28] sm:$0xff] }
  0x8a   :  { %1712 = vmatprep.mubr.msk.bf16.mxu0 %vm576_vm0, %v1971_v4  ;;  %1728 = vmatprep.mubr.msk.bf16.mxu1 %vm576_vm0, %v1973_v5  ;;  %v121_v4 = vld [vmem:[#allocation2 + $0x128] sm:$0xff] }
  0x91   :  { %817 = vmatmul.mubr.bf16.gmra.mrb[52].mxu0 %v1975_v6  ;;  %945 = vmatmul.mubr.bf16.gmra.mrb[52].mxu1 %v1976_v7 }
  0x92   :  { %1713 = vmatprep.mubr.msk.bf16.mxu0 %vm576_vm0, %v1977_v8  ;;  %1729 = vmatprep.mubr.msk.bf16.mxu1 %vm576_vm0, %v1979_v9 }
  0x99   :  { %825 = vmatmul.mubr.bf16.gmra.mrb[56].mxu0 %v1981_v10  ;;  %953 = vmatmul.mubr.bf16.gmra.mrb[56].mxu1 %v1982_v11 }
  0x9a   :  { %1714 = vmatprep.mubr.msk.bf16.mxu0 %vm576_vm0, %v1983_v12  ;;  %1730 = vmatprep.mubr.msk.bf16.mxu1 %vm576_vm0, %v1985_v13 }
  0xa1   :  { %833 = vmatmul.mubr.bf16.gmra.mrb[60].mxu0 %v1987_v14  ;;  %961 = vmatmul.mubr.bf16.gmra.mrb[60].mxu1 %v1988_v15 }
  0xfc   :  { %v714_v18 = vpop.f32.mrb[0].mxu0  ;;  %v842_v19 = vpop.f32.mrb[0].mxu1 }
  0xfd   :  { %v969_v22 = vadd.f32 %v714_v18, %v84_v16  ;;  %v1001_v23 = vadd.f32 %v842_v19, %v116_v17  ;;  %v716_v24 = vpop.f32.mrb[1].mxu0  ;;  %v844_v25 = vpop.f32.mrb[1].mxu1 }
  0xfe   :  { %v717_v26 = vpop.f32.mrb[2].mxu0  ;;  %v845_v27 = vpop.f32.mrb[2].mxu1 }
  0xff   :  { %1034 = vst.msk [vmem:[#allocation2] sm:$0xff] %vm19_vm3, %v969_v22  ;;  %1066 = vst.msk [vmem:[#allocation2 + $0x100] sm:$0xff] %vm19_vm3, %v1001_v23  ;;  %v970_v28 = vadd.f32 %v717_v26, %v85_v20  ;;  %v1002_v29 = vadd.f32 %v845_v27, %v117_v21  ;;  %v719_v30 = vpop.f32.mrb[3].mxu0  ;;  %v847_v31 = vpop.f32.mrb[3].mxu1  ;;  %v90_v27 = vld [vmem:[#allocation2 + $0x30] sm:$0xff] }
 0x101   :  { %1035 = vst.msk [vmem:[#allocation2 + $0x8] sm:$0xff] %vm19_vm3, %v970_v28  ;;  %1067 = vst.msk [vmem:[#allocation2 + $0x108] sm:$0xff] %vm19_vm3, %v1002_v29  ;;  %v122_v28 = vld [vmem:[#allocation2 + $0x130] sm:$0xff] }
 0x104   :  { %v722_v35 = vpop.f32.mrb[4].mxu0  ;;  %v850_v36 = vpop.f32.mrb[4].mxu1 }
 0x105   :  { %v971_v39 = vadd.f32 %v722_v35, %v86_v32  ;;  %v1003_v40 = vadd.f32 %v850_v36, %v118_v33  ;;  %v724_v41 = vpop.f32.mrb[5].mxu0  ;;  %v852_v42 = vpop.f32.mrb[5].mxu1  ;;  %v91_v36 = vld [vmem:[#allocation2 + $0x38] sm:$0xff] }
 0x106   :  { %v1101_v43 = vld [vmem:[#allocation2] sm:$0xff]  ;;  %v725_v45 = vpop.f32.mrb[6].mxu0  ;;  %v853_v46 = vpop.f32.mrb[6].mxu1 }
 0x107   :  { %v1133_v44 = vld [vmem:[#allocation2 + $0x100] sm:$0xff]  ;;  %v1172_v47 = vadd.f32 %v2406_v34, %v1101_v43  ;;  %1036 = vst.msk [vmem:[#allocation2 + $0x10] sm:$0xff] %vm19_vm3, %v971_v39  ;;  %1068 = vst.msk [vmem:[#allocation2 + $0x110] sm:$0xff] %vm19_vm3, %v1003_v40  ;;  %v972_v49 = vadd.f32 %v725_v45, %v87_v37  ;;  %v1004_v50 = vadd.f32 %v853_v46, %v119_v38  ;;  %v727_v51 = vpop.f32.mrb[7].mxu0  ;;  %v855_v52 = vpop.f32.mrb[7].mxu1  ;;  %v123_v37 = vld [vmem:[#allocation2 + $0x138] sm:$0xff] }
 0x108   :  { %v1204_v48 = vadd.f32 %v2406_v34, %v1133_v44  ;;  %v1102_v53 = vld [vmem:[#allocation2 + $0x8] sm:$0xff] }
 0x109   :  { %v1134_v54 = vld [vmem:[#allocation2 + $0x108] sm:$0xff]  ;;  %v1236_v55 = vmax.f32 %v1172_v47, 0.0  ;;  %v1173_v57 = vadd.f32 %v2406_v34, %v1102_v53  ;;  %1037 = vst.msk [vmem:[#allocation2 + $0x18] sm:$0xff] %vm19_vm3, %v972_v49  ;;  %1069 = vst.msk [vmem:[#allocation2 + $0x118] sm:$0xff] %vm19_vm3, %v1004_v50 }
 0x10a   :  { %v1268_v56 = vmax.f32 %v1204_v48, 0.0  ;;  %v1205_v58 = vadd.f32 %v2406_v34, %v1134_v54 }
 0x10b   :  { %v1796_v61 = vpack.c.bf16 %v1236_v55, %v1236_v55  ;;  %v1237_v63 = vmax.f32 %v1173_v57, 0.0 }
 0x10c   :  { %v1828_v62 = vpack.c.bf16 %v1268_v56, %v1268_v56  ;;  %v1269_v0 = vmax.f32 %v1205_v58, 0.0  ;;  %v730_v1 = vpop.f32.mrb[8].mxu0  ;;  %v858_v2 = vpop.f32.mrb[8].mxu1 }
 0x10d   :  { %1557 = vst.msk [vmem:[%s2796_s3] sm:$0xf] %vm1556_vm4, %v1796_v61  ;;  %v1797_v5 = vpack.c.bf16 %v1237_v63, %v1237_v63  ;;  %v973_v7 = vadd.f32 %v730_v1, %v88_v59  ;;  %v1005_v8 = vadd.f32 %v858_v2, %v120_v60  ;;  %v732_v9 = vpop.f32.mrb[9].mxu0  ;;  %v860_v10 = vpop.f32.mrb[9].mxu1  ;;  %v92_v60 = vld [vmem:[#allocation2 + $0x40] sm:$0xff] }
 0x10e   :  { %1589 = vst.msk [vmem:[%s2796_s3 + $0x80] sm:$0xf] %vm1556_vm4, %v1828_v62  ;;  %v1829_v6 = vpack.c.bf16 %v1269_v0, %v1269_v0  ;;  %v1103_v11 = vld [vmem:[#allocation2 + $0x10] sm:$0xff]  ;;  %v733_v13 = vpop.f32.mrb[10].mxu0  ;;  %v861_v14 = vpop.f32.mrb[10].mxu1  ;;  %v124_v61 = vld [vmem:[#allocation2 + $0x140] sm:$0xff] }
 0x10f   :  { %v1135_v12 = vld [vmem:[#allocation2 + $0x110] sm:$0xff]  ;;  %1558 = vst.msk [vmem:[%s2796_s3 + $0x4] sm:$0xf] %vm1556_vm4, %v1797_v5  ;;  %v1174_v15 = vadd.f32 %v2406_v34, %v1103_v11  ;;  %v974_v17 = vadd.f32 %v733_v13, %v89_v3  ;;  %v1006_v18 = vadd.f32 %v861_v14, %v121_v4  ;;  %v735_v19 = vpop.f32.mrb[11].mxu0  ;;  %v863_v20 = vpop.f32.mrb[11].mxu1  ;;  %v93_v4 = vld [vmem:[#allocation2 + $0x48] sm:$0xff] }
 0x110   :  { %1590 = vst.msk [vmem:[%s2796_s3 + $0x84] sm:$0xf] %vm1556_vm4, %v1829_v6  ;;  %v1206_v16 = vadd.f32 %v2406_v34, %v1135_v12  ;;  %v1104_v21 = vld [vmem:[#allocation2 + $0x18] sm:$0xff]  ;;  %v125_v5 = vld [vmem:[#allocation2 + $0x148] sm:$0xff] }
 0x111   :  { %1038 = vst.msk [vmem:[#allocation2 + $0x20] sm:$0xff] %vm19_vm3, %v973_v7  ;;  %1070 = vst.msk [vmem:[#allocation2 + $0x120] sm:$0xff] %vm19_vm3, %v1005_v8  ;;  %v1136_v22 = vld [vmem:[#allocation2 + $0x118] sm:$0xff]  ;;  %v1238_v23 = vmax.f32 %v1174_v15, 0.0  ;;  %v1175_v25 = vadd.f32 %v2406_v34, %v1104_v21 }
 0x112   :  { %v1270_v24 = vmax.f32 %v1206_v16, 0.0  ;;  %v1207_v26 = vadd.f32 %v2406_v34, %v1136_v22  ;;  %1039 = vst.msk [vmem:[#allocation2 + $0x28] sm:$0xff] %vm19_vm3, %v974_v17  ;;  %1071 = vst.msk [vmem:[#allocation2 + $0x128] sm:$0xff] %vm19_vm3, %v1006_v18 }
 0x113   :  { %v1798_v29 = vpack.c.bf16 %v1238_v23, %v1238_v23  ;;  %v1239_v31 = vmax.f32 %v1175_v25, 0.0 }
 0x114   :  { %v1830_v30 = vpack.c.bf16 %v1270_v24, %v1270_v24  ;;  %v1271_v32 = vmax.f32 %v1207_v26, 0.0  ;;  %v738_v33 = vpop.f32.mrb[12].mxu0  ;;  %v866_v35 = vpop.f32.mrb[12].mxu1 }
 0x115   :  { %1559 = vst.msk [vmem:[%s2796_s3 + $0x8] sm:$0xf] %vm1556_vm4, %v1798_v29  ;;  %v1799_v38 = vpack.c.bf16 %v1239_v31, %v1239_v31  ;;  %v975_v40 = vadd.f32 %v738_v33, %v90_v27  ;;  %v1007_v41 = vadd.f32 %v866_v35, %v122_v28  ;;  %v740_v42 = vpop.f32.mrb[13].mxu0  ;;  %v868_v43 = vpop.f32.mrb[13].mxu1  ;;  %v94_v28 = vld [vmem:[#allocation2 + $0x50] sm:$0xff] }
 0x116   :  { %1591 = vst.msk [vmem:[%s2796_s3 + $0x88] sm:$0xf] %vm1556_vm4, %v1830_v30  ;;  %v1831_v39 = vpack.c.bf16 %v1271_v32, %v1271_v32  ;;  %v741_v46 = vpop.f32.mrb[14].mxu0  ;;  %v869_v47 = vpop.f32.mrb[14].mxu1  ;;  %v126_v29 = vld [vmem:[#allocation2 + $0x150] sm:$0xff] }
 0x117   :  { %1560 = vst.msk [vmem:[%s2796_s3 + $0xc] sm:$0xf] %vm1556_vm4, %v1799_v38  ;;  %v976_v50 = vadd.f32 %v741_v46, %v91_v36  ;;  %v1008_v51 = vadd.f32 %v869_v47, %v123_v37  ;;  %v743_v52 = vpop.f32.mrb[15].mxu0  ;;  %v871_v53 = vpop.f32.mrb[15].mxu1  ;;  %v95_v37 = vld [vmem:[#allocation2 + $0x58] sm:$0xff] }
 0x118   :  { %v1105_v44 = vld [vmem:[#allocation2 + $0x20] sm:$0xff]  ;;  %1592 = vst.msk [vmem:[%s2796_s3 + $0x8c] sm:$0xf] %vm1556_vm4, %v1831_v39  ;;  %v127_v38 = vld [vmem:[#allocation2 + $0x158] sm:$0xff] }
 0x119   :  { %v1137_v45 = vld [vmem:[#allocation2 + $0x120] sm:$0xff]  ;;  %v1176_v48 = vadd.f32 %v2406_v34, %v1105_v44  ;;  %1040 = vst.msk [vmem:[#allocation2 + $0x30] sm:$0xff] %vm19_vm3, %v975_v40  ;;  %1072 = vst.msk [vmem:[#allocation2 + $0x130] sm:$0xff] %vm19_vm3, %v1007_v41  ;;  %v1106_v54 = vld [vmem:[#allocation2 + $0x28] sm:$0xff] }
 0x11a   :  { %v1208_v49 = vadd.f32 %v2406_v34, %v1137_v45  ;;  %v1138_v55 = vld [vmem:[#allocation2 + $0x128] sm:$0xff]  ;;  %v1177_v58 = vadd.f32 %v2406_v34, %v1106_v54  ;;  %1041 = vst.msk [vmem:[#allocation2 + $0x38] sm:$0xff] %vm19_vm3, %v976_v50  ;;  %1073 = vst.msk [vmem:[#allocation2 + $0x138] sm:$0xff] %vm19_vm3, %v1008_v51 }
 0x11b   :  { %v1240_v56 = vmax.f32 %v1176_v48, 0.0  ;;  %v1209_v59 = vadd.f32 %v2406_v34, %v1138_v55 }
 0x11c   :  { %v1272_v57 = vmax.f32 %v1208_v49, 0.0  ;;  %v1241_v0 = vmax.f32 %v1177_v58, 0.0  ;;  %v746_v2 = vpop.f32.mrb[16].mxu0  ;;  %v874_v3 = vpop.f32.mrb[16].mxu1 }
 0x11d   :  { %v1800_v62 = vpack.c.bf16 %v1240_v56, %v1240_v56  ;;  %v1273_v1 = vmax.f32 %v1209_v59, 0.0  ;;  %v977_v8 = vadd.f32 %v746_v2, %v92_v60  ;;  %v1009_v9 = vadd.f32 %v874_v3, %v124_v61  ;;  %v748_v10 = vpop.f32.mrb[17].mxu0  ;;  %v876_v11 = vpop.f32.mrb[17].mxu1  ;;  %v96_v61 = vld [vmem:[#allocation2 + $0x60] sm:$0xff] }
 0x11e   :  { %v1832_v63 = vpack.c.bf16 %v1272_v57, %v1272_v57  ;;  %v1801_v6 = vpack.c.bf16 %v1241_v0, %v1241_v0  ;;  %v749_v14 = vpop.f32.mrb[18].mxu0  ;;  %v877_v15 = vpop.f32.mrb[18].mxu1 }
 0x11f   :  { %1561 = vst.msk [vmem:[%s2796_s3 + $0x10] sm:$0xf] %vm1556_vm4, %v1800_v62  ;;  %v1833_v7 = vpack.c.bf16 %v1273_v1, %v1273_v1  ;;  %v978_v18 = vadd.f32 %v749_v14, %v93_v4  ;;  %v1010_v19 = vadd.f32 %v877_v15, %v125_v5  ;;  %v751_v20 = vpop.f32.mrb[19].mxu0  ;;  %v879_v21 = vpop.f32.mrb[19].mxu1  ;;  %v128_v62 = vld [vmem:[#allocation2 + $0x160] sm:$0xff]  ;;  %v97_v5 = vld [vmem:[#allocation2 + $0x68] sm:$0xff] }
 0x120   :  { %1593 = vst.msk [vmem:[%s2796_s3 + $0x90] sm:$0xf] %vm1556_vm4, %v1832_v63  ;;  %v1107_v12 = vld [vmem:[#allocation2 + $0x30] sm:$0xff]  ;;  %1562 = vst.msk [vmem:[%s2796_s3 + $0x14] sm:$0xf] %vm1556_vm4, %v1801_v6  ;;  %v129_v6 = vld [vmem:[#allocation2 + $0x168] sm:$0xff] }
 0x121   :  { %v1139_v13 = vld [vmem:[#allocation2 + $0x130] sm:$0xff]  ;;  %1594 = vst.msk [vmem:[%s2796_s3 + $0x94] sm:$0xf] %vm1556_vm4, %v1833_v7  ;;  %v1178_v16 = vadd.f32 %v2406_v34, %v1107_v12  ;;  %v1108_v22 = vld [vmem:[#allocation2 + $0x38] sm:$0xff] }
 0x122   :  { %v1210_v17 = vadd.f32 %v2406_v34, %v1139_v13  ;;  %1042 = vst.msk [vmem:[#allocation2 + $0x40] sm:$0xff] %vm19_vm3, %v977_v8  ;;  %1074 = vst.msk [vmem:[#allocation2 + $0x140] sm:$0xff] %vm19_vm3, %v1009_v9  ;;  %v1140_v23 = vld [vmem:[#allocation2 + $0x138] sm:$0xff]  ;;  %v1179_v26 = vadd.f32 %v2406_v34, %v1108_v22 }
 0x123   :  { %v1242_v24 = vmax.f32 %v1178_v16, 0.0  ;;  %v1211_v27 = vadd.f32 %v2406_v34, %v1140_v23  ;;  %1043 = vst.msk [vmem:[#allocation2 + $0x48] sm:$0xff] %vm19_vm3, %v978_v18  ;;  %1075 = vst.msk [vmem:[#allocation2 + $0x148] sm:$0xff] %vm19_vm3, %v1010_v19 }
 0x124   :  { %v1274_v25 = vmax.f32 %v1210_v17, 0.0  ;;  %v1243_v32 = vmax.f32 %v1179_v26, 0.0  ;;  %v754_v35 = vpop.f32.mrb[20].mxu0  ;;  %v882_v36 = vpop.f32.mrb[20].mxu1 }
 0x125   :  { %v1802_v30 = vpack.c.bf16 %v1242_v24, %v1242_v24  ;;  %v1275_v33 = vmax.f32 %v1211_v27, 0.0  ;;  %v979_v41 = vadd.f32 %v754_v35, %v94_v28  ;;  %v1011_v42 = vadd.f32 %v882_v36, %v126_v29  ;;  %v756_v43 = vpop.f32.mrb[21].mxu0  ;;  %v884_v44 = vpop.f32.mrb[21].mxu1  ;;  %v98_v29 = vld [vmem:[#allocation2 + $0x70] sm:$0xff] }
 0x126   :  { %v1834_v31 = vpack.c.bf16 %v1274_v25, %v1274_v25  ;;  %v1803_v39 = vpack.c.bf16 %v1243_v32, %v1243_v32  ;;  %v757_v47 = vpop.f32.mrb[22].mxu0  ;;  %v885_v48 = vpop.f32.mrb[22].mxu1 }
 0x127   :  { %1563 = vst.msk [vmem:[%s2796_s3 + $0x18] sm:$0xf] %vm1556_vm4, %v1802_v30  ;;  %v1835_v40 = vpack.c.bf16 %v1275_v33, %v1275_v33  ;;  %v980_v51 = vadd.f32 %v757_v47, %v95_v37  ;;  %v1012_v52 = vadd.f32 %v885_v48, %v127_v38  ;;  %v759_v53 = vpop.f32.mrb[23].mxu0  ;;  %v887_v54 = vpop.f32.mrb[23].mxu1  ;;  %v130_v30 = vld [vmem:[#allocation2 + $0x170] sm:$0xff]  ;;  %v99_v38 = vld [vmem:[#allocation2 + $0x78] sm:$0xff] }
 0x128   :  { %1595 = vst.msk [vmem:[%s2796_s3 + $0x98] sm:$0xf] %vm1556_vm4, %v1834_v31  ;;  %1564 = vst.msk [vmem:[%s2796_s3 + $0x1c] sm:$0xf] %vm1556_vm4, %v1803_v39  ;;  %v131_v39 = vld [vmem:[#allocation2 + $0x178] sm:$0xff] }
 0x129   :  { %v1109_v45 = vld [vmem:[#allocation2 + $0x40] sm:$0xff]  ;;  %1596 = vst.msk [vmem:[%s2796_s3 + $0x9c] sm:$0xf] %vm1556_vm4, %v1835_v40 }
 0x12a   :  { %v1141_v46 = vld [vmem:[#allocation2 + $0x140] sm:$0xff]  ;;  %v1180_v49 = vadd.f32 %v2406_v34, %v1109_v45  ;;  %1044 = vst.msk [vmem:[#allocation2 + $0x50] sm:$0xff] %vm19_vm3, %v979_v41  ;;  %1076 = vst.msk [vmem:[#allocation2 + $0x150] sm:$0xff] %vm19_vm3, %v1011_v42  ;;  %v1110_v55 = vld [vmem:[#allocation2 + $0x48] sm:$0xff] }
 0x12b   :  { %v1212_v50 = vadd.f32 %v2406_v34, %v1141_v46  ;;  %v1142_v56 = vld [vmem:[#allocation2 + $0x148] sm:$0xff]  ;;  %v1181_v59 = vadd.f32 %v2406_v34, %v1110_v55  ;;  %1045 = vst.msk [vmem:[#allocation2 + $0x58] sm:$0xff] %vm19_vm3, %v980_v51  ;;  %1077 = vst.msk [vmem:[#allocation2 + $0x158] sm:$0xff] %vm19_vm3, %v1012_v52 }
 0x12c   :  { %v1244_v57 = vmax.f32 %v1180_v49, 0.0  ;;  %v1213_v60 = vadd.f32 %v2406_v34, %v1142_v56  ;;  %v762_v3 = vpop.f32.mrb[24].mxu0  ;;  %v890_v4 = vpop.f32.mrb[24].mxu1 }
 0x12d   :  { %v1276_v58 = vmax.f32 %v1212_v50, 0.0  ;;  %v1245_v1 = vmax.f32 %v1181_v59, 0.0  ;;  %v981_v9 = vadd.f32 %v762_v3, %v96_v61  ;;  %v1013_v10 = vadd.f32 %v890_v4, %v128_v62  ;;  %v764_v11 = vpop.f32.mrb[25].mxu0  ;;  %v892_v12 = vpop.f32.mrb[25].mxu1  ;;  %v100_v62 = vld [vmem:[#allocation2 + $0x80] sm:$0xff] }
 0x12e   :  { %v1804_v63 = vpack.c.bf16 %v1244_v57, %v1244_v57  ;;  %v1277_v2 = vmax.f32 %v1213_v60, 0.0  ;;  %v765_v15 = vpop.f32.mrb[26].mxu0  ;;  %v893_v16 = vpop.f32.mrb[26].mxu1 }
 0x12f   :  { %v1836_v0 = vpack.c.bf16 %v1276_v58, %v1276_v58  ;;  %v1805_v7 = vpack.c.bf16 %v1245_v1, %v1245_v1  ;;  %1046 = vst.msk [vmem:[#allocation2 + $0x60] sm:$0xff] %vm19_vm3, %v981_v9  ;;  %1078 = vst.msk [vmem:[#allocation2 + $0x160] sm:$0xff] %vm19_vm3, %v1013_v10  ;;  %v982_v19 = vadd.f32 %v765_v15, %v97_v5  ;;  %v767_v21 = vpop.f32.mrb[27].mxu0  ;;  %v895_v22 = vpop.f32.mrb[27].mxu1 }
 0x130   :  { %1565 = vst.msk [vmem:[%s2796_s3 + $0x20] sm:$0xf] %vm1556_vm4, %v1804_v63  ;;  %v1837_v8 = vpack.c.bf16 %v1277_v2, %v1277_v2  ;;  %v1014_v20 = vadd.f32 %v893_v16, %v129_v6  ;;  %v132_v63 = vld [vmem:[#allocation2 + $0x180] sm:$0xff]  ;;  %v101_v6 = vld [vmem:[#allocation2 + $0x88] sm:$0xff] }
 0x131   :  { %1597 = vst.msk [vmem:[%s2796_s3 + $0xa0] sm:$0xf] %vm1556_vm4, %v1836_v0  ;;  %v1111_v13 = vld [vmem:[#allocation2 + $0x50] sm:$0xff]  ;;  %1566 = vst.msk [vmem:[%s2796_s3 + $0x24] sm:$0xf] %vm1556_vm4, %v1805_v7  ;;  %v133_v7 = vld [vmem:[#allocation2 + $0x188] sm:$0xff] }
 0x132   :  { %v1143_v14 = vld [vmem:[#allocation2 + $0x150] sm:$0xff]  ;;  %1598 = vst.msk [vmem:[%s2796_s3 + $0xa4] sm:$0xf] %vm1556_vm4, %v1837_v8  ;;  %v1182_v17 = vadd.f32 %v2406_v34, %v1111_v13  ;;  %v1112_v23 = vld [vmem:[#allocation2 + $0x58] sm:$0xff] }
 0x133   :  { %v1214_v18 = vadd.f32 %v2406_v34, %v1143_v14  ;;  %v1144_v24 = vld [vmem:[#allocation2 + $0x158] sm:$0xff]  ;;  %v1183_v27 = vadd.f32 %v2406_v34, %v1112_v23  ;;  %1047 = vst.msk [vmem:[#allocation2 + $0x68] sm:$0xff] %vm19_vm3, %v982_v19  ;;  %1079 = vst.msk [vmem:[#allocation2 + $0x168] sm:$0xff] %vm19_vm3, %v1014_v20 }
 0x134   :  { %v1246_v25 = vmax.f32 %v1182_v17, 0.0  ;;  %v1215_v28 = vadd.f32 %v2406_v34, %v1144_v24  ;;  %v770_v36 = vpop.f32.mrb[28].mxu0  ;;  %v898_v37 = vpop.f32.mrb[28].mxu1 }
 0x135   :  { %v1278_v26 = vmax.f32 %v1214_v18, 0.0  ;;  %v1247_v33 = vmax.f32 %v1183_v27, 0.0  ;;  %v983_v42 = vadd.f32 %v770_v36, %v98_v29  ;;  %v1015_v43 = vadd.f32 %v898_v37, %v130_v30  ;;  %v772_v44 = vpop.f32.mrb[29].mxu0  ;;  %v900_v45 = vpop.f32.mrb[29].mxu1  ;;  %v102_v30 = vld [vmem:[#allocation2 + $0x90] sm:$0xff] }
 0x136   :  { %v1806_v31 = vpack.c.bf16 %v1246_v25, %v1246_v25  ;;  %v1279_v35 = vmax.f32 %v1215_v28, 0.0  ;;  %v1113_v46 = vld [vmem:[#allocation2 + $0x60] sm:$0xff]  ;;  %v773_v48 = vpop.f32.mrb[30].mxu0  ;;  %v901_v49 = vpop.f32.mrb[30].mxu1 }
 0x137   :  { %v1838_v32 = vpack.c.bf16 %v1278_v26, %v1278_v26  ;;  %v1807_v40 = vpack.c.bf16 %v1247_v33, %v1247_v33  ;;  %v1145_v47 = vld [vmem:[#allocation2 + $0x160] sm:$0xff]  ;;  %v1184_v50 = vadd.f32 %v2406_v34, %v1113_v46  ;;  %1048 = vst.msk [vmem:[#allocation2 + $0x70] sm:$0xff] %vm19_vm3, %v983_v42  ;;  %1080 = vst.msk [vmem:[#allocation2 + $0x170] sm:$0xff] %vm19_vm3, %v1015_v43  ;;  %v775_v54 = vpop.f32.mrb[31].mxu0  ;;  %v903_v55 = vpop.f32.mrb[31].mxu1 }
 0x138   :  { %1567 = vst.msk [vmem:[%s2796_s3 + $0x28] sm:$0xf] %vm1556_vm4, %v1806_v31  ;;  %v1839_v41 = vpack.c.bf16 %v1279_v35, %v1279_v35  ;;  %v1216_v51 = vadd.f32 %v2406_v34, %v1145_v47  ;;  %v984_v52 = vadd.f32 %v773_v48, %v99_v38  ;;  %v1016_v53 = vadd.f32 %v901_v49, %v131_v39  ;;  %v134_v31 = vld [vmem:[#allocation2 + $0x190] sm:$0xff]  ;;  %v103_v39 = vld [vmem:[#allocation2 + $0x98] sm:$0xff] }
 0x139   :  { %1599 = vst.msk [vmem:[%s2796_s3 + $0xa8] sm:$0xf] %vm1556_vm4, %v1838_v32  ;;  %1568 = vst.msk [vmem:[%s2796_s3 + $0x2c] sm:$0xf] %vm1556_vm4, %v1807_v40  ;;  %v1248_v58 = vmax.f32 %v1184_v50, 0.0  ;;  %v135_v40 = vld [vmem:[#allocation2 + $0x198] sm:$0xff] }
 0x13a   :  { %1600 = vst.msk [vmem:[%s2796_s3 + $0xac] sm:$0xf] %vm1556_vm4, %v1839_v41  ;;  %v1114_v56 = vld [vmem:[#allocation2 + $0x68] sm:$0xff]  ;;  %v1280_v59 = vmax.f32 %v1216_v51, 0.0 }
 0x13b   :  { %v1146_v57 = vld [vmem:[#allocation2 + $0x168] sm:$0xff]  ;;  %v1185_v60 = vadd.f32 %v2406_v34, %v1114_v56  ;;  %1049 = vst.msk [vmem:[#allocation2 + $0x78] sm:$0xff] %vm19_vm3, %v984_v52  ;;  %1081 = vst.msk [vmem:[#allocation2 + $0x178] sm:$0xff] %vm19_vm3, %v1016_v53  ;;  %v1808_v0 = vpack.c.bf16 %v1248_v58, %v1248_v58 }
 0x13c   :  { %v1217_v61 = vadd.f32 %v2406_v34, %v1146_v57  ;;  %v1840_v1 = vpack.c.bf16 %v1280_v59, %v1280_v59  ;;  %v778_v4 = vpop.f32.mrb[32].mxu0  ;;  %v906_v5 = vpop.f32.mrb[32].mxu1 }
 0x13d   :  { %v1249_v2 = vmax.f32 %v1185_v60, 0.0  ;;  %1569 = vst.msk [vmem:[%s2796_s3 + $0x30] sm:$0xf] %vm1556_vm4, %v1808_v0  ;;  %v985_v10 = vadd.f32 %v778_v4, %v100_v62  ;;  %v1017_v11 = vadd.f32 %v906_v5, %v132_v63  ;;  %v780_v12 = vpop.f32.mrb[33].mxu0  ;;  %v908_v13 = vpop.f32.mrb[33].mxu1  ;;  %v104_v63 = vld [vmem:[#allocation2 + $0xa0] sm:$0xff] }
 0x13e   :  { %v1281_v3 = vmax.f32 %v1217_v61, 0.0  ;;  %1601 = vst.msk [vmem:[%s2796_s3 + $0xb0] sm:$0xf] %vm1556_vm4, %v1840_v1  ;;  %v1115_v14 = vld [vmem:[#allocation2 + $0x70] sm:$0xff]  ;;  %v781_v16 = vpop.f32.mrb[34].mxu0  ;;  %v909_v17 = vpop.f32.mrb[34].mxu1 }
 0x13f   :  { %v1809_v8 = vpack.c.bf16 %v1249_v2, %v1249_v2  ;;  %v1147_v15 = vld [vmem:[#allocation2 + $0x170] sm:$0xff]  ;;  %v1186_v18 = vadd.f32 %v2406_v34, %v1115_v14  ;;  %1050 = vst.msk [vmem:[#allocation2 + $0x80] sm:$0xff] %vm19_vm3, %v985_v10  ;;  %1082 = vst.msk [vmem:[#allocation2 + $0x180] sm:$0xff] %vm19_vm3, %v1017_v11  ;;  %v986_v20 = vadd.f32 %v781_v16, %v101_v6  ;;  %v783_v22 = vpop.f32.mrb[35].mxu0  ;;  %v911_v23 = vpop.f32.mrb[35].mxu1  ;;  %v136_v0 = vld [vmem:[#allocation2 + $0x1a0] sm:$0xff] }
 0x140   :  { %v1841_v9 = vpack.c.bf16 %v1281_v3, %v1281_v3  ;;  %v1218_v19 = vadd.f32 %v2406_v34, %v1147_v15  ;;  %v1018_v21 = vadd.f32 %v909_v17, %v133_v7  ;;  %v105_v7 = vld [vmem:[#allocation2 + $0xa8] sm:$0xff] }
 0x141   :  { %1570 = vst.msk [vmem:[%s2796_s3 + $0x34] sm:$0xf] %vm1556_vm4, %v1809_v8  ;;  %v1250_v26 = vmax.f32 %v1186_v18, 0.0  ;;  %v137_v8 = vld [vmem:[#allocation2 + $0x1a8] sm:$0xff] }
 0x142   :  { %1602 = vst.msk [vmem:[%s2796_s3 + $0xb4] sm:$0xf] %vm1556_vm4, %v1841_v9  ;;  %v1116_v24 = vld [vmem:[#allocation2 + $0x78] sm:$0xff]  ;;  %v1282_v27 = vmax.f32 %v1218_v19, 0.0 }
 0x143   :  { %v1148_v25 = vld [vmem:[#allocation2 + $0x178] sm:$0xff]  ;;  %v1187_v28 = vadd.f32 %v2406_v34, %v1116_v24  ;;  %1051 = vst.msk [vmem:[#allocation2 + $0x88] sm:$0xff] %vm19_vm3, %v986_v20  ;;  %1083 = vst.msk [vmem:[#allocation2 + $0x188] sm:$0xff] %vm19_vm3, %v1018_v21  ;;  %v1810_v32 = vpack.c.bf16 %v1250_v26, %v1250_v26 }
 0x144   :  { %v1219_v29 = vadd.f32 %v2406_v34, %v1148_v25  ;;  %v1842_v33 = vpack.c.bf16 %v1282_v27, %v1282_v27  ;;  %v786_v37 = vpop.f32.mrb[36].mxu0  ;;  %v914_v38 = vpop.f32.mrb[36].mxu1 }
 0x145   :  { %v1251_v35 = vmax.f32 %v1187_v28, 0.0  ;;  %1571 = vst.msk [vmem:[%s2796_s3 + $0x38] sm:$0xf] %vm1556_vm4, %v1810_v32  ;;  %v987_v43 = vadd.f32 %v786_v37, %v102_v30  ;;  %v1019_v44 = vadd.f32 %v914_v38, %v134_v31  ;;  %v788_v45 = vpop.f32.mrb[37].mxu0  ;;  %v916_v46 = vpop.f32.mrb[37].mxu1  ;;  %v106_v31 = vld [vmem:[#allocation2 + $0xb0] sm:$0xff] }
 0x146   :  { %v1283_v36 = vmax.f32 %v1219_v29, 0.0  ;;  %1603 = vst.msk [vmem:[%s2796_s3 + $0xb8] sm:$0xf] %vm1556_vm4, %v1842_v33  ;;  %v1117_v47 = vld [vmem:[#allocation2 + $0x80] sm:$0xff]  ;;  %v789_v49 = vpop.f32.mrb[38].mxu0  ;;  %v917_v50 = vpop.f32.mrb[38].mxu1 }
 0x147   :  { %v1811_v41 = vpack.c.bf16 %v1251_v35, %v1251_v35  ;;  %v1149_v48 = vld [vmem:[#allocation2 + $0x180] sm:$0xff]  ;;  %v1188_v51 = vadd.f32 %v2406_v34, %v1117_v47  ;;  %1052 = vst.msk [vmem:[#allocation2 + $0x90] sm:$0xff] %vm19_vm3, %v987_v43  ;;  %1084 = vst.msk [vmem:[#allocation2 + $0x190] sm:$0xff] %vm19_vm3, %v1019_v44  ;;  %v988_v53 = vadd.f32 %v789_v49, %v103_v39  ;;  %v791_v55 = vpop.f32.mrb[39].mxu0  ;;  %v919_v56 = vpop.f32.mrb[39].mxu1  ;;  %v138_v32 = vld [vmem:[#allocation2 + $0x1b0] sm:$0xff] }
 0x148   :  { %v1843_v42 = vpack.c.bf16 %v1283_v36, %v1283_v36  ;;  %v1220_v52 = vadd.f32 %v2406_v34, %v1149_v48  ;;  %v1020_v54 = vadd.f32 %v917_v50, %v135_v40  ;;  %v107_v40 = vld [vmem:[#allocation2 + $0xb8] sm:$0xff] }
 0x149   :  { %1572 = vst.msk [vmem:[%s2796_s3 + $0x3c] sm:$0xf] %vm1556_vm4, %v1811_v41  ;;  %v1252_v59 = vmax.f32 %v1188_v51, 0.0  ;;  %v139_v41 = vld [vmem:[#allocation2 + $0x1b8] sm:$0xff] }
 0x14a   :  { %1604 = vst.msk [vmem:[%s2796_s3 + $0xbc] sm:$0xf] %vm1556_vm4, %v1843_v42  ;;  %v1118_v57 = vld [vmem:[#allocation2 + $0x88] sm:$0xff]  ;;  %v1284_v60 = vmax.f32 %v1220_v52, 0.0 }
 0x14b   :  { %v1150_v58 = vld [vmem:[#allocation2 + $0x188] sm:$0xff]  ;;  %v1189_v61 = vadd.f32 %v2406_v34, %v1118_v57  ;;  %1053 = vst.msk [vmem:[#allocation2 + $0x98] sm:$0xff] %vm19_vm3, %v988_v53  ;;  %1085 = vst.msk [vmem:[#allocation2 + $0x198] sm:$0xff] %vm19_vm3, %v1020_v54  ;;  %v1812_v1 = vpack.c.bf16 %v1252_v59, %v1252_v59 }
 0x14c   :  { %v1221_v62 = vadd.f32 %v2406_v34, %v1150_v58  ;;  %v1844_v2 = vpack.c.bf16 %v1284_v60, %v1284_v60  ;;  %v794_v5 = vpop.f32.mrb[40].mxu0  ;;  %v922_v6 = vpop.f32.mrb[40].mxu1 }
 0x14d   :  { %v1253_v3 = vmax.f32 %v1189_v61, 0.0  ;;  %1573 = vst.msk [vmem:[%s2796_s3 + $0x40] sm:$0xf] %vm1556_vm4, %v1812_v1  ;;  %v989_v11 = vadd.f32 %v794_v5, %v104_v63  ;;  %v1021_v12 = vadd.f32 %v922_v6, %v136_v0  ;;  %v796_v13 = vpop.f32.mrb[41].mxu0  ;;  %v924_v14 = vpop.f32.mrb[41].mxu1  ;;  %v108_v0 = vld [vmem:[#allocation2 + $0xc0] sm:$0xff] }
 0x14e   :  { %v1285_v4 = vmax.f32 %v1221_v62, 0.0  ;;  %1605 = vst.msk [vmem:[%s2796_s3 + $0xc0] sm:$0xf] %vm1556_vm4, %v1844_v2  ;;  %v1119_v15 = vld [vmem:[#allocation2 + $0x90] sm:$0xff]  ;;  %v797_v17 = vpop.f32.mrb[42].mxu0  ;;  %v925_v18 = vpop.f32.mrb[42].mxu1 }
 0x14f   :  { %v1813_v9 = vpack.c.bf16 %v1253_v3, %v1253_v3  ;;  %v1151_v16 = vld [vmem:[#allocation2 + $0x190] sm:$0xff]  ;;  %v1190_v19 = vadd.f32 %v2406_v34, %v1119_v15  ;;  %1054 = vst.msk [vmem:[#allocation2 + $0xa0] sm:$0xff] %vm19_vm3, %v989_v11  ;;  %1086 = vst.msk [vmem:[#allocation2 + $0x1a0] sm:$0xff] %vm19_vm3, %v1021_v12  ;;  %v990_v21 = vadd.f32 %v797_v17, %v105_v7  ;;  %v799_v23 = vpop.f32.mrb[43].mxu0  ;;  %v927_v24 = vpop.f32.mrb[43].mxu1  ;;  %v140_v1 = vld [vmem:[#allocation2 + $0x1c0] sm:$0xff] }
 0x150   :  { %v1845_v10 = vpack.c.bf16 %v1285_v4, %v1285_v4  ;;  %v1222_v20 = vadd.f32 %v2406_v34, %v1151_v16  ;;  %v1022_v22 = vadd.f32 %v925_v18, %v137_v8  ;;  %v109_v8 = vld [vmem:[#allocation2 + $0xc8] sm:$0xff] }
 0x151   :  { %1574 = vst.msk [vmem:[%s2796_s3 + $0x44] sm:$0xf] %vm1556_vm4, %v1813_v9  ;;  %v1254_v27 = vmax.f32 %v1190_v19, 0.0  ;;  %v141_v9 = vld [vmem:[#allocation2 + $0x1c8] sm:$0xff] }
 0x152   :  { %1606 = vst.msk [vmem:[%s2796_s3 + $0xc4] sm:$0xf] %vm1556_vm4, %v1845_v10  ;;  %v1120_v25 = vld [vmem:[#allocation2 + $0x98] sm:$0xff]  ;;  %v1286_v28 = vmax.f32 %v1222_v20, 0.0 }
 0x153   :  { %v1152_v26 = vld [vmem:[#allocation2 + $0x198] sm:$0xff]  ;;  %v1191_v29 = vadd.f32 %v2406_v34, %v1120_v25  ;;  %1055 = vst.msk [vmem:[#allocation2 + $0xa8] sm:$0xff] %vm19_vm3, %v990_v21  ;;  %1087 = vst.msk [vmem:[#allocation2 + $0x1a8] sm:$0xff] %vm19_vm3, %v1022_v22  ;;  %v1814_v33 = vpack.c.bf16 %v1254_v27, %v1254_v27 }
 0x154   :  { %v1223_v30 = vadd.f32 %v2406_v34, %v1152_v26  ;;  %v1846_v35 = vpack.c.bf16 %v1286_v28, %v1286_v28  ;;  %v802_v38 = vpop.f32.mrb[44].mxu0  ;;  %v930_v39 = vpop.f32.mrb[44].mxu1 }
 0x155   :  { %v1255_v36 = vmax.f32 %v1191_v29, 0.0  ;;  %1575 = vst.msk [vmem:[%s2796_s3 + $0x48] sm:$0xf] %vm1556_vm4, %v1814_v33  ;;  %v991_v44 = vadd.f32 %v802_v38, %v106_v31  ;;  %v1023_v45 = vadd.f32 %v930_v39, %v138_v32  ;;  %v804_v46 = vpop.f32.mrb[45].mxu0  ;;  %v932_v47 = vpop.f32.mrb[45].mxu1  ;;  %v110_v32 = vld [vmem:[#allocation2 + $0xd0] sm:$0xff] }
 0x156   :  { %v1287_v37 = vmax.f32 %v1223_v30, 0.0  ;;  %1607 = vst.msk [vmem:[%s2796_s3 + $0xc8] sm:$0xf] %vm1556_vm4, %v1846_v35  ;;  %v1121_v48 = vld [vmem:[#allocation2 + $0xa0] sm:$0xff]  ;;  %v805_v50 = vpop.f32.mrb[46].mxu0  ;;  %v933_v51 = vpop.f32.mrb[46].mxu1 }
 0x157   :  { %v1815_v42 = vpack.c.bf16 %v1255_v36, %v1255_v36  ;;  %v1153_v49 = vld [vmem:[#allocation2 + $0x1a0] sm:$0xff]  ;;  %v1192_v52 = vadd.f32 %v2406_v34, %v1121_v48  ;;  %1056 = vst.msk [vmem:[#allocation2 + $0xb0] sm:$0xff] %vm19_vm3, %v991_v44  ;;  %1088 = vst.msk [vmem:[#allocation2 + $0x1b0] sm:$0xff] %vm19_vm3, %v1023_v45  ;;  %v992_v54 = vadd.f32 %v805_v50, %v107_v40  ;;  %v807_v56 = vpop.f32.mrb[47].mxu0  ;;  %v935_v57 = vpop.f32.mrb[47].mxu1  ;;  %v142_v33 = vld [vmem:[#allocation2 + $0x1d0] sm:$0xff] }
 0x158   :  { %v1847_v43 = vpack.c.bf16 %v1287_v37, %v1287_v37  ;;  %v1224_v53 = vadd.f32 %v2406_v34, %v1153_v49  ;;  %v1024_v55 = vadd.f32 %v933_v51, %v139_v41  ;;  %v111_v41 = vld [vmem:[#allocation2 + $0xd8] sm:$0xff] }
 0x159   :  { %1576 = vst.msk [vmem:[%s2796_s3 + $0x4c] sm:$0xf] %vm1556_vm4, %v1815_v42  ;;  %v1256_v60 = vmax.f32 %v1192_v52, 0.0  ;;  %v143_v42 = vld [vmem:[#allocation2 + $0x1d8] sm:$0xff] }
 0x15a   :  { %1608 = vst.msk [vmem:[%s2796_s3 + $0xcc] sm:$0xf] %vm1556_vm4, %v1847_v43  ;;  %v1122_v58 = vld [vmem:[#allocation2 + $0xa8] sm:$0xff]  ;;  %v1288_v61 = vmax.f32 %v1224_v53, 0.0 }
 0x15b   :  { %v1154_v59 = vld [vmem:[#allocation2 + $0x1a8] sm:$0xff]  ;;  %v1193_v62 = vadd.f32 %v2406_v34, %v1122_v58  ;;  %1057 = vst.msk [vmem:[#allocation2 + $0xb8] sm:$0xff] %vm19_vm3, %v992_v54  ;;  %1089 = vst.msk [vmem:[#allocation2 + $0x1b8] sm:$0xff] %vm19_vm3, %v1024_v55  ;;  %v1816_v2 = vpack.c.bf16 %v1256_v60, %v1256_v60 }
 0x15c   :  { %v1225_v63 = vadd.f32 %v2406_v34, %v1154_v59  ;;  %v1848_v3 = vpack.c.bf16 %v1288_v61, %v1288_v61  ;;  %v810_v6 = vpop.f32.mrb[48].mxu0  ;;  %v938_v7 = vpop.f32.mrb[48].mxu1 }
 0x15d   :  { %v1257_v4 = vmax.f32 %v1193_v62, 0.0  ;;  %1577 = vst.msk [vmem:[%s2796_s3 + $0x50] sm:$0xf] %vm1556_vm4, %v1816_v2  ;;  %v993_v12 = vadd.f32 %v810_v6, %v108_v0  ;;  %v1025_v13 = vadd.f32 %v938_v7, %v140_v1  ;;  %v812_v14 = vpop.f32.mrb[49].mxu0  ;;  %v940_v15 = vpop.f32.mrb[49].mxu1  ;;  %v112_v1 = vld [vmem:[#allocation2 + $0xe0] sm:$0xff] }
 0x15e   :  { %v1289_v5 = vmax.f32 %v1225_v63, 0.0  ;;  %1609 = vst.msk [vmem:[%s2796_s3 + $0xd0] sm:$0xf] %vm1556_vm4, %v1848_v3  ;;  %v1123_v16 = vld [vmem:[#allocation2 + $0xb0] sm:$0xff]  ;;  %v813_v18 = vpop.f32.mrb[50].mxu0  ;;  %v941_v19 = vpop.f32.mrb[50].mxu1 }
 0x15f   :  { %v1817_v10 = vpack.c.bf16 %v1257_v4, %v1257_v4  ;;  %v1155_v17 = vld [vmem:[#allocation2 + $0x1b0] sm:$0xff]  ;;  %v1194_v20 = vadd.f32 %v2406_v34, %v1123_v16  ;;  %1058 = vst.msk [vmem:[#allocation2 + $0xc0] sm:$0xff] %vm19_vm3, %v993_v12  ;;  %1090 = vst.msk [vmem:[#allocation2 + $0x1c0] sm:$0xff] %vm19_vm3, %v1025_v13  ;;  %v994_v22 = vadd.f32 %v813_v18, %v109_v8  ;;  %v815_v24 = vpop.f32.mrb[51].mxu0  ;;  %v943_v25 = vpop.f32.mrb[51].mxu1  ;;  %v144_v2 = vld [vmem:[#allocation2 + $0x1e0] sm:$0xff] }
 0x160   :  { %v1849_v11 = vpack.c.bf16 %v1289_v5, %v1289_v5  ;;  %v1226_v21 = vadd.f32 %v2406_v34, %v1155_v17  ;;  %v1026_v23 = vadd.f32 %v941_v19, %v141_v9  ;;  %v113_v9 = vld [vmem:[#allocation2 + $0xe8] sm:$0xff] }
 0x161   :  { %1578 = vst.msk [vmem:[%s2796_s3 + $0x54] sm:$0xf] %vm1556_vm4, %v1817_v10  ;;  %v1258_v28 = vmax.f32 %v1194_v20, 0.0  ;;  %v145_v10 = vld [vmem:[#allocation2 + $0x1e8] sm:$0xff]  ;;  %v2723_v20 = vld [vmem:[%s2795_s2] ss:$0 sm:$0xff] }
 0x162   :  { %1610 = vst.msk [vmem:[%s2796_s3 + $0xd4] sm:$0xf] %vm1556_vm4, %v1849_v11  ;;  %v1124_v26 = vld [vmem:[#allocation2 + $0xb8] sm:$0xff]  ;;  %v1290_v29 = vmax.f32 %v1226_v21, 0.0 }
 0x163   :  { %v1156_v27 = vld [vmem:[#allocation2 + $0x1b8] sm:$0xff]  ;;  %v1195_v30 = vadd.f32 %v2406_v34, %v1124_v26  ;;  %1059 = vst.msk [vmem:[#allocation2 + $0xc8] sm:$0xff] %vm19_vm3, %v994_v22  ;;  %1091 = vst.msk [vmem:[#allocation2 + $0x1c8] sm:$0xff] %vm19_vm3, %v1026_v23  ;;  %v1818_v35 = vpack.c.bf16 %v1258_v28, %v1258_v28 }
 0x164   :  { %v1227_v31 = vadd.f32 %v2406_v34, %v1156_v27  ;;  %v1850_v36 = vpack.c.bf16 %v1290_v29, %v1290_v29  ;;  %v818_v39 = vpop.f32.mrb[52].mxu0  ;;  %v946_v40 = vpop.f32.mrb[52].mxu1 }
 0x165   :  { %v1259_v37 = vmax.f32 %v1195_v30, 0.0  ;;  %1579 = vst.msk [vmem:[%s2796_s3 + $0x58] sm:$0xf] %vm1556_vm4, %v1818_v35  ;;  %v995_v45 = vadd.f32 %v818_v39, %v110_v32  ;;  %v1027_v46 = vadd.f32 %v946_v40, %v142_v33  ;;  %v820_v47 = vpop.f32.mrb[53].mxu0  ;;  %v948_v48 = vpop.f32.mrb[53].mxu1  ;;  %v114_v33 = vld [vmem:[#allocation2 + $0xf0] sm:$0xff] }
 0x166   :  { %v1291_v38 = vmax.f32 %v1227_v31, 0.0  ;;  %1611 = vst.msk [vmem:[%s2796_s3 + $0xd8] sm:$0xf] %vm1556_vm4, %v1850_v36  ;;  %v1125_v49 = vld [vmem:[#allocation2 + $0xc0] sm:$0xff]  ;;  %v821_v51 = vpop.f32.mrb[54].mxu0  ;;  %v949_v52 = vpop.f32.mrb[54].mxu1 }
 0x167   :  { %v1819_v43 = vpack.c.bf16 %v1259_v37, %v1259_v37  ;;  %v1157_v50 = vld [vmem:[#allocation2 + $0x1c0] sm:$0xff]  ;;  %v1196_v53 = vadd.f32 %v2406_v34, %v1125_v49  ;;  %1060 = vst.msk [vmem:[#allocation2 + $0xd0] sm:$0xff] %vm19_vm3, %v995_v45  ;;  %1092 = vst.msk [vmem:[#allocation2 + $0x1d0] sm:$0xff] %vm19_vm3, %v1027_v46  ;;  %v996_v55 = vadd.f32 %v821_v51, %v111_v41  ;;  %v823_v57 = vpop.f32.mrb[55].mxu0  ;;  %v951_v58 = vpop.f32.mrb[55].mxu1  ;;  %v146_v35 = vld [vmem:[#allocation2 + $0x1f0] sm:$0xff] }
 0x168   :  { %v1851_v44 = vpack.c.bf16 %v1291_v38, %v1291_v38  ;;  %v1228_v54 = vadd.f32 %v2406_v34, %v1157_v50  ;;  %v1028_v56 = vadd.f32 %v949_v52, %v143_v42  ;;  %v115_v42 = vld [vmem:[#allocation2 + $0xf8] sm:$0xff] }
 0x169   :  { %1580 = vst.msk [vmem:[%s2796_s3 + $0x5c] sm:$0xf] %vm1556_vm4, %v1819_v43  ;;  %v1260_v61 = vmax.f32 %v1196_v53, 0.0  ;;  %v147_v43 = vld [vmem:[#allocation2 + $0x1f8] sm:$0xff] }
 0x16a   :  { %1612 = vst.msk [vmem:[%s2796_s3 + $0xdc] sm:$0xf] %vm1556_vm4, %v1851_v44  ;;  %v1126_v59 = vld [vmem:[#allocation2 + $0xc8] sm:$0xff]  ;;  %v1292_v62 = vmax.f32 %v1228_v54, 0.0 }
 0x16b   :  { %v1158_v60 = vld [vmem:[#allocation2 + $0x1c8] sm:$0xff]  ;;  %v1197_v63 = vadd.f32 %v2406_v34, %v1126_v59  ;;  %1061 = vst.msk [vmem:[#allocation2 + $0xd8] sm:$0xff] %vm19_vm3, %v996_v55  ;;  %1093 = vst.msk [vmem:[#allocation2 + $0x1d8] sm:$0xff] %vm19_vm3, %v1028_v56  ;;  %v1820_v3 = vpack.c.bf16 %v1260_v61, %v1260_v61 }
 0x16c   :  { %v1229_v0 = vadd.f32 %v2406_v34, %v1158_v60  ;;  %v1852_v4 = vpack.c.bf16 %v1292_v62, %v1292_v62  ;;  %v826_v7 = vpop.f32.mrb[56].mxu0  ;;  %v954_v8 = vpop.f32.mrb[56].mxu1 }
 0x16d   :  { %v1261_v5 = vmax.f32 %v1197_v63, 0.0  ;;  %1581 = vst.msk [vmem:[%s2796_s3 + $0x60] sm:$0xf] %vm1556_vm4, %v1820_v3  ;;  %v997_v12 = vadd.f32 %v826_v7, %v112_v1  ;;  %v1029_v13 = vadd.f32 %v954_v8, %v144_v2  ;;  %v828_v14 = vpop.f32.mrb[57].mxu0  ;;  %v956_v15 = vpop.f32.mrb[57].mxu1 }
 0x16e   :  { %v1293_v6 = vmax.f32 %v1229_v0, 0.0  ;;  %1613 = vst.msk [vmem:[%s2796_s3 + $0xe0] sm:$0xf] %vm1556_vm4, %v1852_v4  ;;  %v1127_v16 = vld [vmem:[#allocation2 + $0xd0] sm:$0xff]  ;;  %v829_v18 = vpop.f32.mrb[58].mxu0  ;;  %v957_v19 = vpop.f32.mrb[58].mxu1 }
 0x16f   :  { %v1821_v34 = vpack.c.bf16 %v1261_v5, %v1261_v5  ;;  %v1159_v17 = vld [vmem:[#allocation2 + $0x1d0] sm:$0xff]  ;;  %v1198_v21 = vadd.f32 %v2723_v20, %v1127_v16  ;;  %1062 = vst.msk [vmem:[#allocation2 + $0xe0] sm:$0xff] %vm19_vm3, %v997_v12  ;;  %1094 = vst.msk [vmem:[#allocation2 + $0x1e0] sm:$0xff] %vm19_vm3, %v1029_v13  ;;  %v998_v23 = vadd.f32 %v829_v18, %v113_v9  ;;  %v831_v25 = vpop.f32.mrb[59].mxu0  ;;  %v959_v26 = vpop.f32.mrb[59].mxu1 }
 0x170   :  { %v1853_v11 = vpack.c.bf16 %v1293_v6, %v1293_v6  ;;  %v1230_v22 = vadd.f32 %v2723_v20, %v1159_v17  ;;  %v1030_v24 = vadd.f32 %v957_v19, %v145_v10 }
 0x171   :  { %1582 = vst.msk [vmem:[%s2796_s3 + $0x64] sm:$0xf] %vm1556_vm4, %v1821_v34  ;;  %v1262_v29 = vmax.f32 %v1198_v21, 0.0 }
 0x172   :  { %1614 = vst.msk [vmem:[%s2796_s3 + $0xe4] sm:$0xf] %vm1556_vm4, %v1853_v11  ;;  %v1128_v27 = vld [vmem:[#allocation2 + $0xd8] sm:$0xff]  ;;  %v1294_v30 = vmax.f32 %v1230_v22, 0.0 }
 0x173   :  { %v1160_v28 = vld [vmem:[#allocation2 + $0x1d8] sm:$0xff]  ;;  %v1199_v31 = vadd.f32 %v2723_v20, %v1128_v27  ;;  %1063 = vst.msk [vmem:[#allocation2 + $0xe8] sm:$0xff] %vm19_vm3, %v998_v23  ;;  %1095 = vst.msk [vmem:[#allocation2 + $0x1e8] sm:$0xff] %vm19_vm3, %v1030_v24  ;;  %v1822_v36 = vpack.c.bf16 %v1262_v29, %v1262_v29 }
 0x174   :  { %v1231_v32 = vadd.f32 %v2723_v20, %v1160_v28  ;;  %v1854_v37 = vpack.c.bf16 %v1294_v30, %v1294_v30  ;;  %v834_v40 = vpop.f32.mrb[60].mxu0  ;;  %v962_v41 = vpop.f32.mrb[60].mxu1 }
 0x175   :  { %v1263_v38 = vmax.f32 %v1199_v31, 0.0  ;;  %1583 = vst.msk [vmem:[%s2796_s3 + $0x68] sm:$0xf] %vm1556_vm4, %v1822_v36  ;;  %v999_v46 = vadd.f32 %v834_v40, %v114_v33  ;;  %v1031_v47 = vadd.f32 %v962_v41, %v146_v35  ;;  %v836_v48 = vpop.f32.mrb[61].mxu0  ;;  %v964_v49 = vpop.f32.mrb[61].mxu1 }
 0x176   :  { %v1295_v39 = vmax.f32 %v1231_v32, 0.0  ;;  %1615 = vst.msk [vmem:[%s2796_s3 + $0xe8] sm:$0xf] %vm1556_vm4, %v1854_v37  ;;  %v1129_v50 = vld [vmem:[#allocation2 + $0xe0] sm:$0xff]  ;;  %v837_v52 = vpop.f32.mrb[62].mxu0  ;;  %v965_v53 = vpop.f32.mrb[62].mxu1 }
 0x177   :  { %v1823_v44 = vpack.c.bf16 %v1263_v38, %v1263_v38  ;;  %v1161_v51 = vld [vmem:[#allocation2 + $0x1e0] sm:$0xff]  ;;  %v1200_v54 = vadd.f32 %v2723_v20, %v1129_v50  ;;  %1064 = vst.msk [vmem:[#allocation2 + $0xf0] sm:$0xff] %vm19_vm3, %v999_v46  ;;  %1096 = vst.msk [vmem:[#allocation2 + $0x1f0] sm:$0xff] %vm19_vm3, %v1031_v47  ;;  %v1000_v56 = vadd.f32 %v837_v52, %v115_v42  ;;  %v839_v58 = vpop.f32.mrb[63].mxu0  ;;  %v967_v59 = vpop.f32.mrb[63].mxu1 }
 0x178   :  { %v1855_v45 = vpack.c.bf16 %v1295_v39, %v1295_v39  ;;  %v1232_v55 = vadd.f32 %v2723_v20, %v1161_v51  ;;  %v1032_v57 = vadd.f32 %v965_v53, %v147_v43 }
 0x179   :  { %1584 = vst.msk [vmem:[%s2796_s3 + $0x6c] sm:$0xf] %vm1556_vm4, %v1823_v44  ;;  %v1264_v62 = vmax.f32 %v1200_v54, 0.0 }
 0x17a   :  { %1616 = vst.msk [vmem:[%s2796_s3 + $0xec] sm:$0xf] %vm1556_vm4, %v1855_v45  ;;  %v1130_v60 = vld [vmem:[#allocation2 + $0xe8] sm:$0xff]  ;;  %v1296_v63 = vmax.f32 %v1232_v55, 0.0 }
 0x17b   :  { %v1162_v61 = vld [vmem:[#allocation2 + $0x1e8] sm:$0xff]  ;;  %v1201_v0 = vadd.f32 %v2723_v20, %v1130_v60  ;;  %1065 = vst.msk [vmem:[#allocation2 + $0xf8] sm:$0xff] %vm19_vm3, %v1000_v56  ;;  %1097 = vst.msk [vmem:[#allocation2 + $0x1f8] sm:$0xff] %vm19_vm3, %v1032_v57  ;;  %v1824_v2 = vpack.c.bf16 %v1264_v62, %v1264_v62 }
 0x17c   :  { %v1233_v1 = vadd.f32 %v2723_v20, %v1162_v61  ;;  %v1856_v3 = vpack.c.bf16 %v1296_v63, %v1296_v63 }
 0x17d   :  { %v1265_v4 = vmax.f32 %v1201_v0, 0.0  ;;  %1585 = vst.msk [vmem:[%s2796_s3 + $0x70] sm:$0xf] %vm1556_vm4, %v1824_v2 }
 0x17e   :  { %v1297_v5 = vmax.f32 %v1233_v1, 0.0  ;;  %1617 = vst.msk [vmem:[%s2796_s3 + $0xf0] sm:$0xf] %vm1556_vm4, %v1856_v3  ;;  %v1131_v8 = vld [vmem:[#allocation2 + $0xf0] sm:$0xff] }
 0x17f   :  { %v1825_v6 = vpack.c.bf16 %v1265_v4, %v1265_v4  ;;  %v1163_v9 = vld [vmem:[#allocation2 + $0x1f0] sm:$0xff]  ;;  %v1202_v10 = vadd.f32 %v2723_v20, %v1131_v8 }
 0x180   :  { %v1857_v7 = vpack.c.bf16 %v1297_v5, %v1297_v5  ;;  %v1234_v34 = vadd.f32 %v2723_v20, %v1163_v9 }
 0x181   :  { %1586 = vst.msk [vmem:[%s2796_s3 + $0x74] sm:$0xf] %vm1556_vm4, %v1825_v6  ;;  %v1266_v13 = vmax.f32 %v1202_v10, 0.0 }
 0x182   :  { %1618 = vst.msk [vmem:[%s2796_s3 + $0xf4] sm:$0xf] %vm1556_vm4, %v1857_v7  ;;  %v1132_v11 = vld [vmem:[#allocation2 + $0xf8] sm:$0xff]  ;;  %v1298_v14 = vmax.f32 %v1234_v34, 0.0 }
 0x183   :  { %v1164_v12 = vld [vmem:[#allocation2 + $0x1f8] sm:$0xff]  ;;  %v1203_v15 = vadd.f32 %v2723_v20, %v1132_v11  ;;  %v1826_v17 = vpack.c.bf16 %v1266_v13, %v1266_v13 }
 0x184   :  { %v1235_v16 = vadd.f32 %v2723_v20, %v1164_v12  ;;  %v1858_v18 = vpack.c.bf16 %v1298_v14, %v1298_v14 }
 0x185   :  { %v1267_v19 = vmax.f32 %v1203_v15, 0.0  ;;  %1587 = vst.msk [vmem:[%s2796_s3 + $0x78] sm:$0xf] %vm1556_vm4, %v1826_v17 }
 0x186   :  { %v1299_v21 = vmax.f32 %v1235_v16, 0.0  ;;  %1619 = vst.msk [vmem:[%s2796_s3 + $0xf8] sm:$0xf] %vm1556_vm4, %v1858_v18 }
 0x187   :  { %v1827_v22 = vpack.c.bf16 %v1267_v19, %v1267_v19 }
 0x188   :  { %v1859_v23 = vpack.c.bf16 %v1299_v21, %v1299_v21 }
 0x189   :  { %1588 = vst.msk [vmem:[%s2796_s3 + $0x7c] sm:$0xf] %vm1556_vm4, %v1827_v22 }
 0x18a   :  { %1620 = vst.msk [vmem:[%s2796_s3 + $0xfc] sm:$0xf] %vm1556_vm4, %v1859_v23 }

</bundles_post_ra>
